<compile_context>
chip_gen: v6e
topology: v6e:2x2x1
jax: 0.10.0
libtpu: 0.0.40
codegen_flags: <defaults>
</compile_context>

<pallas_src>
import functools

import jax
import jax.numpy as jnp
import numpy as np
from jax import lax
from jax.experimental import pallas as pl
from jax.experimental.pallas import tpu as pltpu

EPS = 1e-5        # PyTorch LayerNorm default
LANE = 128        # TPU lane width: channel dims padded to this for lane density


def _round_up(x, m):
    return ((x + m - 1) // m) * m


def _conv_out_len(l, k, s, p, d):
    return (l + 2 * p - d * (k - 1) - 1) // s + 1


def _derive_layer_cfgs(cfg):
    """Static per-layer geometry (mirrors Encoder.build_module)."""
    _, c, l = cfg["input_shape"]
    num_layers = len(cfg["kernel_sizes"])
    layer_cfgs = []
    cur_c, cur_l = c, l
    for i in range(num_layers - 1):
        k, s, p, d = (cfg["kernel_sizes"][i], cfg["strides"][i],
                      cfg["paddings"][i], cfg["dilations"][i])
        c_out = cfg["num_output_channels"][i]
        l_out = _conv_out_len(cur_l, k, s, p, d)
        layer_cfgs.append(dict(
            k=k, s=s, p=p, d=d,
            c_in=cur_c, c_in_pad=_round_up(cur_c, LANE),
            c_out=c_out, ch=_round_up(c_out, LANE),
            l_in=cur_l, l_out=l_out,
            p_next=cfg["paddings"][i + 1]))
        cur_c, cur_l = c_out, l_out
    k, s, p, d = (cfg["kernel_sizes"][-1], cfg["strides"][-1],
                  cfg["paddings"][-1], cfg["dilations"][-1])
    c_out = cfg["num_output_channels"][-1]
    final_cfg = dict(k=k, s=s, p=p, d=d,
                     c_in=cur_c, c_in_pad=_round_up(cur_c, LANE),
                     c_out=c_out, ch=_round_up(c_out, LANE),
                     l_in=cur_l, l_out=_conv_out_len(cur_l, k, s, p, d))
    return layer_cfgs, final_cfg


# --------------------------------------------------------------------------- #
# Parameter packing (done once, outside the hot path)
# --------------------------------------------------------------------------- #
def prepare_params(params, cfg, compute_dtype=jnp.bfloat16):
    """Pack PyTorch-layout params into fused, padded, pre-transposed arrays.

    Gated layer i:
      w:     (K, C_in_pad, 2*CH)  value half in lanes [0,CH), gate in [CH,2CH)
      b:     (1, 2*CH)            f32
      gamma: (L_out, CH)          f32 (transposed from (C_out, L_out), zero-padded)
      beta:  (L_out, CH)          f32
    Final conv:
      w: (K, C_in_pad, CH), b: (1, CH)
    """
    layer_cfgs, final_cfg = _derive_layer_cfgs(cfg)
    packed = {}
    for i, lc in enumerate(layer_cfgs):
        p = params[f"conv_{i}"]
        K, cin, cinp = lc["k"], lc["c_in"], lc["c_in_pad"]
        cout, ch, lout = lc["c_out"], lc["ch"], lc["l_out"]
        assert p["gamma"].shape == (cout, lout), "LayerNorm affine shape mismatch"
        assert p["beta"].shape == (cout, lout), "LayerNorm affine shape mismatch"
        # PyTorch Conv1d weight (C_out, C_in, K) -> per-tap (K, C_in, C_out)
        w = jnp.zeros((K, cinp, 2 * ch), jnp.float32)
        w = w.at[:, :cin, :cout].set(jnp.transpose(p["wf"], (2, 1, 0)))
        w = w.at[:, :cin, ch:ch + cout].set(jnp.transpose(p["wg"], (2, 1, 0)))
        b = jnp.zeros((1, 2 * ch), jnp.float32)
        b = b.at[0, :cout].set(p["bf"])
        b = b.at[0, ch:ch + cout].set(p["bg"])
        gamma = jnp.zeros((lout, ch), jnp.float32).at[:, :cout].set(p["gamma"].T)
        beta = jnp.zeros((lout, ch), jnp.float32).at[:, :cout].set(p["beta"].T)
        packed[f"conv_{i}"] = dict(w=w.astype(compute_dtype), b=b,
                                   gamma=gamma, beta=beta)
    p = params["final_conv"]
    lc = final_cfg
    K, cin, cinp, cout, ch = lc["k"], lc["c_in"], lc["c_in_pad"], lc["c_out"], lc["ch"]
    w = jnp.zeros((K, cinp, ch), jnp.float32)
    w = w.at[:, :cin, :cout].set(jnp.transpose(p["w"], (2, 1, 0)))
    b = jnp.zeros((1, ch), jnp.float32).at[0, :cout].set(p["b"])
    packed["final_conv"] = dict(w=w.astype(compute_dtype), b=b)
    return packed


# --------------------------------------------------------------------------- #
# Fused encoder kernel (one grid step == one batch element through all layers)
# --------------------------------------------------------------------------- #
def _make_encoder_kernel(layer_cfgs, final_cfg):
    n_gated = len(layer_cfgs)

    def tap(ref, k, d, s, l_out):
        # k-th conv tap: rows {k*d + t*s, t=0..L_out-1} of the padded input.
        if s == 1:
            return ref[pl.ds(k * d, l_out), :]
        return ref[pl.ds(k * d, l_out, stride=s), :]

    def kernel(*refs):
        x_ref = refs[0]
        pos = 1
        gated = []
        for _ in range(n_gated):
            gated.append(refs[pos:pos + 4])
            pos += 4
        wfin_ref, bfin_ref = refs[pos], refs[pos + 1]
        o_ref = refs[pos + 2]
        scratch = refs[pos + 3:]

        cur = x_ref
        for i, lc in enumerate(layer_cfgs):
            w_ref, b_ref, gamma_ref, beta_ref = gated[i]
            nxt = scratch[i]
            K, s, d = lc["k"], lc["s"], lc["d"]
            l_out, c_out, ch = lc["l_out"], lc["c_out"], lc["ch"]

            # Fused value||gate conv: one matmul per tap, 2*ch lane-dense N dim,
            # bf16 (or f32) operands with f32 accumulation.
            acc = jnp.dot(tap(cur, 0, d, s, l_out).astype(w_ref.dtype), w_ref[0],
                          preferred_element_type=jnp.float32)
            for k in range(1, K):
                acc = acc + jnp.dot(tap(cur, k, d, s, l_out).astype(w_ref.dtype),
                                    w_ref[k], preferred_element_type=jnp.float32)
            acc = acc + b_ref[...]

            h = acc[:, :ch]          # value half  (lanes [0, ch))
            g = acc[:, ch:]          # gate half   (lanes [ch, 2*ch))
            y = h * jax.nn.sigmoid(g)          # padded channels stay exactly 0

            # LayerNorm over the valid (c_out, l_out) slab of this sample (f32).
            cnt = float(l_out * c_out)
            mean = jnp.sum(y) * (1.0 / cnt)
            ch_iota = lax.broadcasted_iota(jnp.int32, (l_out, ch), 1)
            centered = jnp.where(ch_iota < c_out, y - mean, 0.0)   # mask chan pad
            var = jnp.sum(centered * centered) * (1.0 / cnt)
            out = centered * lax.rsqrt(var + EPS) * gamma_ref[...] + beta_ref[...]

            # Stage into the next layer's conv-padded input (stays in VMEM).
            nxt[...] = jnp.zeros_like(nxt)         # zero conv-padding rows
            nxt[pl.ds(lc["p_next"], l_out), :] = out
            cur = nxt

        # Final plain nn.Conv1d.
        K, s, d = final_cfg["k"], final_cfg["s"], final_cfg["d"]
        l_out = final_cfg["l_out"]
        acc = jnp.dot(tap(cur, 0, d, s, l_out).astype(wfin_ref.dtype), wfin_ref[0],
                      preferred_element_type=jnp.float32)
        for k in range(1, K):
            acc = acc + jnp.dot(tap(cur, k, d, s, l_out).astype(wfin_ref.dtype),
                                wfin_ref[k], preferred_element_type=jnp.float32)
        o_ref[...] = acc + bfin_ref[...]           # lane-dense (l_out, 128) store

    return kernel


def encoder_pallas(x_ncl, packed, cfg):
    """Forward pass of Encoder.  x_ncl: (N, C_in, L) float32 (PyTorch layout)."""
    layer_cfgs, final_cfg = _derive_layer_cfgs(cfg)
    first = layer_cfgs[0] if layer_cfgs else final_cfg
    n, c_in, l_in = x_ncl.shape
    assert (c_in, l_in) == (first["c_in"], first["l_in"])

    # NCL -> NLC; build the first conv's L padding and the 128-lane channel
    # padding once here (only the raw input ever takes this path).
    l0_pad = l_in + 2 * first["p"]
    x_pad = jnp.zeros((n, l0_pad, first["c_in_pad"]), jnp.float32)
    x_pad = x_pad.at[:, first["p"]:first["p"] + l_in, :c_in].set(
        jnp.transpose(x_ncl, (0, 2, 1)))

    inputs = [x_pad]
    in_specs = [pl.BlockSpec((None, l0_pad, first["c_in_pad"]),
                             lambda b: (b, 0, 0))]
    for i in range(len(layer_cfgs)):
        p = packed[f"conv_{i}"]
        inputs += [p["w"], p["b"], p["gamma"], p["beta"]]
        # Grid-invariant blocks: block index never changes -> DMA'd only once.
        in_specs += [pl.BlockSpec(p["w"].shape, lambda b: (0, 0, 0)),
                     pl.BlockSpec(p["b"].shape, lambda b: (0, 0)),
                     pl.BlockSpec(p["gamma"].shape, lambda b: (0, 0)),
                     pl.BlockSpec(p["beta"].shape, lambda b: (0, 0))]
    pf = packed["final_conv"]
    inputs += [pf["w"], pf["b"]]
    in_specs += [pl.BlockSpec(pf["w"].shape, lambda b: (0, 0, 0)),
                 pl.BlockSpec(pf["b"].shape, lambda b: (0, 0))]

    # One VMEM staging buffer per gated layer output (= next layer's input,
    # including that layer's conv padding rows).
    scratch_shapes = [pltpu.VMEM((lc["l_out"] + 2 * lc["p_next"], lc["ch"]),
                                 jnp.float32)
                      for lc in layer_cfgs]

    l_f, ch_f = final_cfg["l_out"], final_cfg["ch"]
    out_padded = pl.pallas_call(
        _make_encoder_kernel(layer_cfgs, final_cfg),
        out_shape=jax.ShapeDtypeStruct((n, l_f, ch_f), jnp.float32),
        grid=(n,),
        in_specs=in_specs,
        out_specs=pl.BlockSpec((None, l_f, ch_f), lambda b: (b, 0, 0)),
        scratch_shapes=scratch_shapes,
        compiler_params=pltpu.CompilerParams(
            dimension_semantics=("parallel",),     # batch across v7x TensorCores
            vmem_limit_bytes=32 * 1024 * 1024),
    )(*inputs)

    # Strip channel padding, back to NCL.
    return jnp.transpose(out_padded[:, :, :final_cfg["c_out"]], (0, 2, 1))


# --------------------------------------------------------------------------- #
# Pure-JAX reference (NCL, lax.conv) for correctness checking
# --------------------------------------------------------------------------- #
def _conv1d_ref(x, w, b, stride, padding, dilation):
    y = lax.conv_general_dilated(
        x, w, window_strides=(stride,), padding=[(padding, padding)],
        rhs_dilation=(dilation,), dimension_numbers=("NCH", "OIH", "NCH"))
    return y + b[None, :, None]


def encoder_ref(x_ncl, params, cfg):
    out = x_ncl
    num_layers = len(cfg["kernel_sizes"])
    for i in range(num_layers - 1):
        p = params[f"conv_{i}"]
        h = _conv1d_ref(out, p["wf"], p["bf"], cfg["strides"][i],
                        cfg["paddings"][i], cfg["dilations"][i])
        g = _conv1d_ref(out, p["wg"], p["bg"], cfg["strides"][i],
                        cfg["paddings"][i], cfg["dilations"][i])
        y = h * jax.nn.sigmoid(g)
        mean = jnp.mean(y, axis=(1, 2), keepdims=True)
        var = jnp.mean((y - mean) ** 2, axis=(1, 2), keepdims=True)
        out = (y - mean) / jnp.sqrt(var + EPS) * p["gamma"][None] + p["beta"][None]
    p = params["final_conv"]
    return _conv1d_ref(out, p["w"], p["b"], cfg["strides"][-1],
                       cfg["paddings"][-1], cfg["dilations"][-1])


# --------------------------------------------------------------------------- #
# Deterministic parameter construction (mirrors Encoder.build_module shapes)
# --------------------------------------------------------------------------- #
def build_params(cfg, key):
    n, c, l = cfg["input_shape"]
    params = {}
    num_layers = len(cfg["kernel_sizes"])
    cur_c, cur_l = c, l
    for i in range(num_layers - 1):
        k, s, p, d = (cfg["kernel_sizes"][i], cfg["strides"][i],
                      cfg["paddings"][i], cfg["dilations"][i])
        c_out = cfg["num_output_channels"][i]
        l_out = _conv_out_len(cur_l, k, s, p, d)
        key, k1, k2, k3, k4 = jax.random.split(key, 5)
        params[f"conv_{i}"] = {
            "wf": 0.2 * jax.random.normal(k1, (c_out, cur_c, k), jnp.float32),
            "bf": 0.1 * jax.random.normal(k2, (c_out,), jnp.float32),
            "wg": 0.2 * jax.random.normal(k3, (c_out, cur_c, k), jnp.float32),
            "bg": 0.1 * jax.random.normal(k4, (c_out,), jnp.float32),
            "gamma": jnp.ones((c_out, l_out), jnp.float32),
            "beta": jnp.zeros((c_out, l_out), jnp.float32),
        }
        cur_c, cur_l = c_out, l_out
    k, s, p, d = (cfg["kernel_sizes"][-1], cfg["strides"][-1],
                  cfg["paddings"][-1], cfg["dilations"][-1])
    c_out = cfg["num_output_channels"][-1]
    key, k1, k2 = jax.random.split(key, 3)
    params["final_conv"] = {
        "w": 0.2 * jax.random.normal(k1, (c_out, cur_c, k), jnp.float32),
        "b": 0.1 * jax.random.normal(k2, (c_out,), jnp.float32),
    }
    return params


# --------------------------------------------------------------------------- #
if __name__ == "__main__":
    cfg = dict(
        input_shape=(2, 4, 16),          # (N, C_in, L) — PyTorch NCL
        kernel_sizes=[3, 3, 3],
        strides=[2, 2, 1],               # downsampling: 16 -> 8 -> 4 -> 4
        num_output_channels=[8, 8, 16],
        paddings=[1, 1, 1],
        dilations=[1, 1, 1],
    )

    key = jax.random.PRNGKey(0)
    key, xkey = jax.random.split(key)
    x = jax.random.normal(xkey, cfg["input_shape"], jnp.float32)
    params = build_params(cfg, key)

    fwd = jax.jit(functools.partial(encoder_pallas, cfg=cfg))

    # 1) Strict numerical check with f32 MXU operands.
    packed_f32 = prepare_params(params, cfg, compute_dtype=jnp.float32)
    out_f32 = jax.block_until_ready(fwd(x, packed_f32))
    ref = encoder_ref(x, params, cfg)
    assert out_f32.shape == ref.shape == (2, cfg["num_output_channels"][-1], 4)
    np.testing.assert_allclose(np.asarray(out_f32), np.asarray(ref),
                               rtol=1e-4, atol=1e-4)

    # 2) Production mode: bf16 weights/operands on the MXU, f32 accumulation
    #    and f32 LayerNorm / sigmoid (loose sanity check vs the f32 run).
    packed_bf16 = prepare_params(params, cfg, compute_dtype=jnp.bfloat16)
    out_bf16 = jax.block_until_ready(fwd(x, packed_bf16))
    assert out_bf16.shape == ref.shape
    assert np.all(np.isfinite(np.asarray(out_bf16)))
    assert np.max(np.abs(np.asarray(out_bf16) - np.asarray(out_f32))) < 0.3

    print("KERNEL_OK")
</pallas_src>

<mosaic_0001>
module attributes {stable_mosaic.version = 11 : i64} {
  func.func @kernel(%arg0: i32, %arg1: memref<1x18x128xf32, #tpu.memory_space<vmem>>, %arg2: memref<3x128x256xf32, #tpu.memory_space<vmem>>, %arg3: memref<1x256xf32, #tpu.memory_space<vmem>>, %arg4: memref<8x128xf32, #tpu.memory_space<vmem>>, %arg5: memref<8x128xf32, #tpu.memory_space<vmem>>, %arg6: memref<3x128x256xf32, #tpu.memory_space<vmem>>, %arg7: memref<1x256xf32, #tpu.memory_space<vmem>>, %arg8: memref<4x128xf32, #tpu.memory_space<vmem>>, %arg9: memref<4x128xf32, #tpu.memory_space<vmem>>, %arg10: memref<3x128x128xf32, #tpu.memory_space<vmem>>, %arg11: memref<1x128xf32, #tpu.memory_space<vmem>>, %arg12: memref<1x4x128xf32, #tpu.memory_space<vmem>>, %arg13: memref<10x128xf32, #tpu.memory_space<vmem>>, %arg14: memref<6x128xf32, #tpu.memory_space<vmem>>) attributes {dimension_semantics = [#tpu.dimension_semantics<parallel>], iteration_bounds = array<i64: 2>, scalar_prefetch = 0 : i64, scratch_operands = 2 : i64, tpu.core_type = #tpu.core_type<tc>, window_params = [{transform_indices = @transform_0, window_bounds = array<i64: 1, 18, 128>}, {pipeline_mode = #tpu.pipeline_mode<synchronous>, transform_indices = @transform_1, window_bounds = array<i64: 3, 128, 256>}, {pipeline_mode = #tpu.pipeline_mode<synchronous>, transform_indices = @transform_2, window_bounds = array<i64: 1, 256>}, {pipeline_mode = #tpu.pipeline_mode<synchronous>, transform_indices = @transform_3, window_bounds = array<i64: 8, 128>}, {pipeline_mode = #tpu.pipeline_mode<synchronous>, transform_indices = @transform_4, window_bounds = array<i64: 8, 128>}, {pipeline_mode = #tpu.pipeline_mode<synchronous>, transform_indices = @transform_5, window_bounds = array<i64: 3, 128, 256>}, {pipeline_mode = #tpu.pipeline_mode<synchronous>, transform_indices = @transform_6, window_bounds = array<i64: 1, 256>}, {pipeline_mode = #tpu.pipeline_mode<synchronous>, transform_indices = @transform_7, window_bounds = array<i64: 4, 128>}, {pipeline_mode = #tpu.pipeline_mode<synchronous>, transform_indices = @transform_8, window_bounds = array<i64: 4, 128>}, {pipeline_mode = #tpu.pipeline_mode<synchronous>, transform_indices = @transform_9, window_bounds = array<i64: 3, 128, 128>}, {pipeline_mode = #tpu.pipeline_mode<synchronous>, transform_indices = @transform_10, window_bounds = array<i64: 1, 128>}, {transform_indices = @transform_11, window_bounds = array<i64: 1, 4, 128>}]} {
    %c0 = arith.constant 0 : index
    %c0_0 = arith.constant 0 : index
    %c0_1 = arith.constant 0 : index
    %0 = tpu.strided_load %arg1[%c0, %c0_0, %c0_1] {strides = array<i32: 1, 2, 1>} : memref<1x18x128xf32, #tpu.memory_space<vmem>>, vector<1x8x128xf32>
    %1 = vector.shape_cast %0 : vector<1x8x128xf32> to vector<8x128xf32>
    %c0_2 = arith.constant 0 : index
    %c0_3 = arith.constant 0 : index
    %c0_4 = arith.constant 0 : index
    %2 = vector.load %arg2[%c0_2, %c0_3, %c0_4] : memref<3x128x256xf32, #tpu.memory_space<vmem>>, vector<1x128x256xf32>
    %3 = vector.shape_cast %2 : vector<1x128x256xf32> to vector<128x256xf32>
    %cst = arith.constant dense<0.000000e+00> : vector<8x256xf32>
    %4 = tpu.matmul %1, %3, %cst {dimension_numbers = #tpu.dot_dimension_numbers<[1], [0], [0], [1], [0, 0, 1, 1], [], []>} : vector<8x128xf32>, vector<128x256xf32>, vector<8x256xf32> -> vector<8x256xf32>
    %c0_5 = arith.constant 0 : index
    %c1 = arith.constant 1 : index
    %c0_6 = arith.constant 0 : index
    %5 = tpu.strided_load %arg1[%c0_5, %c1, %c0_6] {strides = array<i32: 1, 2, 1>} : memref<1x18x128xf32, #tpu.memory_space<vmem>>, vector<1x8x128xf32>
    %6 = vector.shape_cast %5 : vector<1x8x128xf32> to vector<8x128xf32>
    %c1_7 = arith.constant 1 : index
    %c0_8 = arith.constant 0 : index
    %c0_9 = arith.constant 0 : index
    %7 = vector.load %arg2[%c1_7, %c0_8, %c0_9] : memref<3x128x256xf32, #tpu.memory_space<vmem>>, vector<1x128x256xf32>
    %8 = vector.shape_cast %7 : vector<1x128x256xf32> to vector<128x256xf32>
    %cst_10 = arith.constant dense<0.000000e+00> : vector<8x256xf32>
    %9 = tpu.matmul %6, %8, %cst_10 {dimension_numbers = #tpu.dot_dimension_numbers<[1], [0], [0], [1], [0, 0, 1, 1], [], []>} : vector<8x128xf32>, vector<128x256xf32>, vector<8x256xf32> -> vector<8x256xf32>
    %10 = arith.addf %4, %9 : vector<8x256xf32>
    %c0_11 = arith.constant 0 : index
    %c2 = arith.constant 2 : index
    %c0_12 = arith.constant 0 : index
    %11 = tpu.strided_load %arg1[%c0_11, %c2, %c0_12] {strides = array<i32: 1, 2, 1>} : memref<1x18x128xf32, #tpu.memory_space<vmem>>, vector<1x8x128xf32>
    %12 = vector.shape_cast %11 : vector<1x8x128xf32> to vector<8x128xf32>
    %c2_13 = arith.constant 2 : index
    %c0_14 = arith.constant 0 : index
    %c0_15 = arith.constant 0 : index
    %13 = vector.load %arg2[%c2_13, %c0_14, %c0_15] : memref<3x128x256xf32, #tpu.memory_space<vmem>>, vector<1x128x256xf32>
    %14 = vector.shape_cast %13 : vector<1x128x256xf32> to vector<128x256xf32>
    %cst_16 = arith.constant dense<0.000000e+00> : vector<8x256xf32>
    %15 = tpu.matmul %12, %14, %cst_16 {dimension_numbers = #tpu.dot_dimension_numbers<[1], [0], [0], [1], [0, 0, 1, 1], [], []>} : vector<8x128xf32>, vector<128x256xf32>, vector<8x256xf32> -> vector<8x256xf32>
    %16 = arith.addf %10, %15 : vector<8x256xf32>
    %c0_17 = arith.constant 0 : index
    %c0_18 = arith.constant 0 : index
    %17 = vector.load %arg3[%c0_17, %c0_18] : memref<1x256xf32, #tpu.memory_space<vmem>>, vector<1x256xf32>
    %18 = vector.broadcast %17 : vector<1x256xf32> to vector<8x256xf32>
    %19 = arith.addf %16, %18 : vector<8x256xf32>
    %20 = vector.extract_strided_slice %19 {offsets = [0, 0], sizes = [8, 128], strides = [1, 1]} : vector<8x256xf32> to vector<8x128xf32>
    %21 = vector.extract_strided_slice %19 {offsets = [0, 128], sizes = [8, 128], strides = [1, 1]} : vector<8x256xf32> to vector<8x128xf32>
    %22 = arith.negf %21 : vector<8x128xf32>
    %23 = math.exp %22 : vector<8x128xf32>
    %cst_19 = arith.constant 1.000000e+00 : f32
    %24 = vector.broadcast %cst_19 : f32 to vector<8x128xf32>
    %25 = arith.addf %24, %23 : vector<8x128xf32>
    %26 = arith.divf %24, %25 : vector<8x128xf32>
    %27 = arith.mulf %20, %26 : vector<8x128xf32>
    %28 = vector.shape_cast %27 : vector<8x128xf32> to vector<1x8x128xf32>
    %cst_20 = arith.constant dense<0.000000e+00> : vector<1xf32>
    %29 = vector.multi_reduction <add>, %28, %cst_20 [1, 2] : vector<1x8x128xf32> to vector<1xf32>
    %30 = vector.shape_cast %29 : vector<1xf32> to vector<1x1x1xf32>
    %31 = vector.extract %30[0, 0, 0] : f32 from vector<1x1x1xf32>
    %cst_21 = arith.constant 1.562500e-02 : f32
    %32 = arith.mulf %31, %cst_21 : f32
    %33 = tpu.iota {dimensions = array<i32: 1>} : vector<8x128xi32>
    %c8_i32 = arith.constant 8 : i32
    %34 = vector.broadcast %c8_i32 : i32 to vector<8x128xi32>
    %35 = arith.cmpi slt, %33, %34 : vector<8x128xi32>
    %36 = vector.broadcast %32 : f32 to vector<8x128xf32>
    %37 = arith.subf %27, %36 : vector<8x128xf32>
    %cst_22 = arith.constant 0.000000e+00 : f32
    %38 = vector.broadcast %cst_22 : f32 to vector<8x128xf32>
    %39 = arith.select %35, %37, %38 : vector<8x128xi1>, vector<8x128xf32>
    %40 = arith.mulf %39, %39 : vector<8x128xf32>
    %41 = vector.shape_cast %40 : vector<8x128xf32> to vector<1x8x128xf32>
    %cst_23 = arith.constant dense<0.000000e+00> : vector<1xf32>
    %42 = vector.multi_reduction <add>, %41, %cst_23 [1, 2] : vector<1x8x128xf32> to vector<1xf32>
    %43 = vector.shape_cast %42 : vector<1xf32> to vector<1x1x1xf32>
    %44 = vector.extract %43[0, 0, 0] : f32 from vector<1x1x1xf32>
    %cst_24 = arith.constant 1.562500e-02 : f32
    %45 = arith.mulf %44, %cst_24 : f32
    %cst_25 = arith.constant 9.99999974E-6 : f32
    %46 = arith.addf %45, %cst_25 : f32
    %47 = math.rsqrt %46 : f32
    %48 = vector.broadcast %47 : f32 to vector<8x128xf32>
    %49 = arith.mulf %39, %48 : vector<8x128xf32>
    %c0_26 = arith.constant 0 : index
    %c0_27 = arith.constant 0 : index
    %50 = vector.load %arg4[%c0_26, %c0_27] : memref<8x128xf32, #tpu.memory_space<vmem>>, vector<8x128xf32>
    %51 = arith.mulf %49, %50 : vector<8x128xf32>
    %c0_28 = arith.constant 0 : index
    %c0_29 = arith.constant 0 : index
    %52 = vector.load %arg5[%c0_28, %c0_29] : memref<8x128xf32, #tpu.memory_space<vmem>>, vector<8x128xf32>
    %53 = arith.addf %51, %52 : vector<8x128xf32>
    %cst_30 = arith.constant 0.000000e+00 : f32
    %54 = vector.broadcast %cst_30 : f32 to vector<10x128xf32>
    %c0_31 = arith.constant 0 : index
    %c0_32 = arith.constant 0 : index
    %55 = vector.load %arg13[%c0_31, %c0_32] : memref<10x128xf32, #tpu.memory_space<vmem>>, vector<10x128xf32>
    tpu.vector_store %arg13[%c0_31, %c0_32], %54 {strides = array<i32>} : memref<10x128xf32, #tpu.memory_space<vmem>>, vector<10x128xf32>,
    %c1_33 = arith.constant 1 : index
    %c0_34 = arith.constant 0 : index
    %56 = vector.load %arg13[%c1_33, %c0_34] : memref<10x128xf32, #tpu.memory_space<vmem>>, vector<8x128xf32>
    tpu.vector_store %arg13[%c1_33, %c0_34], %53 {strides = array<i32>} : memref<10x128xf32, #tpu.memory_space<vmem>>, vector<8x128xf32>,
    %c0_35 = arith.constant 0 : index
    %c0_36 = arith.constant 0 : index
    %57 = tpu.strided_load %arg13[%c0_35, %c0_36] {strides = array<i32: 2, 1>} : memref<10x128xf32, #tpu.memory_space<vmem>>, vector<4x128xf32>
    %c0_37 = arith.constant 0 : index
    %c0_38 = arith.constant 0 : index
    %c0_39 = arith.constant 0 : index
    %58 = vector.load %arg6[%c0_37, %c0_38, %c0_39] : memref<3x128x256xf32, #tpu.memory_space<vmem>>, vector<1x128x256xf32>
    %59 = vector.shape_cast %58 : vector<1x128x256xf32> to vector<128x256xf32>
    %cst_40 = arith.constant dense<0.000000e+00> : vector<4x256xf32>
    %60 = tpu.matmul %57, %59, %cst_40 {dimension_numbers = #tpu.dot_dimension_numbers<[1], [0], [0], [1], [0, 0, 1, 1], [], []>} : vector<4x128xf32>, vector<128x256xf32>, vector<4x256xf32> -> vector<4x256xf32>
    %c1_41 = arith.constant 1 : index
    %c0_42 = arith.constant 0 : index
    %61 = tpu.strided_load %arg13[%c1_41, %c0_42] {strides = array<i32: 2, 1>} : memref<10x128xf32, #tpu.memory_space<vmem>>, vector<4x128xf32>
    %c1_43 = arith.constant 1 : index
    %c0_44 = arith.constant 0 : index
    %c0_45 = arith.constant 0 : index
    %62 = vector.load %arg6[%c1_43, %c0_44, %c0_45] : memref<3x128x256xf32, #tpu.memory_space<vmem>>, vector<1x128x256xf32>
    %63 = vector.shape_cast %62 : vector<1x128x256xf32> to vector<128x256xf32>
    %cst_46 = arith.constant dense<0.000000e+00> : vector<4x256xf32>
    %64 = tpu.matmul %61, %63, %cst_46 {dimension_numbers = #tpu.dot_dimension_numbers<[1], [0], [0], [1], [0, 0, 1, 1], [], []>} : vector<4x128xf32>, vector<128x256xf32>, vector<4x256xf32> -> vector<4x256xf32>
    %65 = arith.addf %60, %64 : vector<4x256xf32>
    %c2_47 = arith.constant 2 : index
    %c0_48 = arith.constant 0 : index
    %66 = tpu.strided_load %arg13[%c2_47, %c0_48] {strides = array<i32: 2, 1>} : memref<10x128xf32, #tpu.memory_space<vmem>>, vector<4x128xf32>
    %c2_49 = arith.constant 2 : index
    %c0_50 = arith.constant 0 : index
    %c0_51 = arith.constant 0 : index
    %67 = vector.load %arg6[%c2_49, %c0_50, %c0_51] : memref<3x128x256xf32, #tpu.memory_space<vmem>>, vector<1x128x256xf32>
    %68 = vector.shape_cast %67 : vector<1x128x256xf32> to vector<128x256xf32>
    %cst_52 = arith.constant dense<0.000000e+00> : vector<4x256xf32>
    %69 = tpu.matmul %66, %68, %cst_52 {dimension_numbers = #tpu.dot_dimension_numbers<[1], [0], [0], [1], [0, 0, 1, 1], [], []>} : vector<4x128xf32>, vector<128x256xf32>, vector<4x256xf32> -> vector<4x256xf32>
    %70 = arith.addf %65, %69 : vector<4x256xf32>
    %c0_53 = arith.constant 0 : index
    %c0_54 = arith.constant 0 : index
    %71 = vector.load %arg7[%c0_53, %c0_54] : memref<1x256xf32, #tpu.memory_space<vmem>>, vector<1x256xf32>
    %72 = vector.broadcast %71 : vector<1x256xf32> to vector<4x256xf32>
    %73 = arith.addf %70, %72 : vector<4x256xf32>
    %74 = vector.extract_strided_slice %73 {offsets = [0, 0], sizes = [4, 128], strides = [1, 1]} : vector<4x256xf32> to vector<4x128xf32>
    %75 = vector.extract_strided_slice %73 {offsets = [0, 128], sizes = [4, 128], strides = [1, 1]} : vector<4x256xf32> to vector<4x128xf32>
    %76 = arith.negf %75 : vector<4x128xf32>
    %77 = math.exp %76 : vector<4x128xf32>
    %cst_55 = arith.constant 1.000000e+00 : f32
    %78 = vector.broadcast %cst_55 : f32 to vector<4x128xf32>
    %79 = arith.addf %78, %77 : vector<4x128xf32>
    %80 = arith.divf %78, %79 : vector<4x128xf32>
    %81 = arith.mulf %74, %80 : vector<4x128xf32>
    %82 = vector.shape_cast %81 : vector<4x128xf32> to vector<1x4x128xf32>
    %cst_56 = arith.constant dense<0.000000e+00> : vector<1xf32>
    %83 = vector.multi_reduction <add>, %82, %cst_56 [1, 2] : vector<1x4x128xf32> to vector<1xf32>
    %84 = vector.shape_cast %83 : vector<1xf32> to vector<1x1x1xf32>
    %85 = vector.extract %84[0, 0, 0] : f32 from vector<1x1x1xf32>
    %cst_57 = arith.constant 3.125000e-02 : f32
    %86 = arith.mulf %85, %cst_57 : f32
    %87 = tpu.iota {dimensions = array<i32: 1>} : vector<4x128xi32>
    %c8_i32_58 = arith.constant 8 : i32
    %88 = vector.broadcast %c8_i32_58 : i32 to vector<4x128xi32>
    %89 = arith.cmpi slt, %87, %88 : vector<4x128xi32>
    %90 = vector.broadcast %86 : f32 to vector<4x128xf32>
    %91 = arith.subf %81, %90 : vector<4x128xf32>
    %cst_59 = arith.constant 0.000000e+00 : f32
    %92 = vector.broadcast %cst_59 : f32 to vector<4x128xf32>
    %93 = arith.select %89, %91, %92 : vector<4x128xi1>, vector<4x128xf32>
    %94 = arith.mulf %93, %93 : vector<4x128xf32>
    %95 = vector.shape_cast %94 : vector<4x128xf32> to vector<1x4x128xf32>
    %cst_60 = arith.constant dense<0.000000e+00> : vector<1xf32>
    %96 = vector.multi_reduction <add>, %95, %cst_60 [1, 2] : vector<1x4x128xf32> to vector<1xf32>
    %97 = vector.shape_cast %96 : vector<1xf32> to vector<1x1x1xf32>
    %98 = vector.extract %97[0, 0, 0] : f32 from vector<1x1x1xf32>
    %cst_61 = arith.constant 3.125000e-02 : f32
    %99 = arith.mulf %98, %cst_61 : f32
    %cst_62 = arith.constant 9.99999974E-6 : f32
    %100 = arith.addf %99, %cst_62 : f32
    %101 = math.rsqrt %100 : f32
    %102 = vector.broadcast %101 : f32 to vector<4x128xf32>
    %103 = arith.mulf %93, %102 : vector<4x128xf32>
    %c0_63 = arith.constant 0 : index
    %c0_64 = arith.constant 0 : index
    %104 = vector.load %arg8[%c0_63, %c0_64] : memref<4x128xf32, #tpu.memory_space<vmem>>, vector<4x128xf32>
    %105 = arith.mulf %103, %104 : vector<4x128xf32>
    %c0_65 = arith.constant 0 : index
    %c0_66 = arith.constant 0 : index
    %106 = vector.load %arg9[%c0_65, %c0_66] : memref<4x128xf32, #tpu.memory_space<vmem>>, vector<4x128xf32>
    %107 = arith.addf %105, %106 : vector<4x128xf32>
    %cst_67 = arith.constant 0.000000e+00 : f32
    %108 = vector.broadcast %cst_67 : f32 to vector<6x128xf32>
    %c0_68 = arith.constant 0 : index
    %c0_69 = arith.constant 0 : index
    %109 = vector.load %arg14[%c0_68, %c0_69] : memref<6x128xf32, #tpu.memory_space<vmem>>, vector<6x128xf32>
    tpu.vector_store %arg14[%c0_68, %c0_69], %108 {strides = array<i32>} : memref<6x128xf32, #tpu.memory_space<vmem>>, vector<6x128xf32>,
    %c1_70 = arith.constant 1 : index
    %c0_71 = arith.constant 0 : index
    %110 = vector.load %arg14[%c1_70, %c0_71] : memref<6x128xf32, #tpu.memory_space<vmem>>, vector<4x128xf32>
    tpu.vector_store %arg14[%c1_70, %c0_71], %107 {strides = array<i32>} : memref<6x128xf32, #tpu.memory_space<vmem>>, vector<4x128xf32>,
    %c0_72 = arith.constant 0 : index
    %c0_73 = arith.constant 0 : index
    %111 = vector.load %arg14[%c0_72, %c0_73] : memref<6x128xf32, #tpu.memory_space<vmem>>, vector<4x128xf32>
    %c0_74 = arith.constant 0 : index
    %c0_75 = arith.constant 0 : index
    %c0_76 = arith.constant 0 : index
    %112 = vector.load %arg10[%c0_74, %c0_75, %c0_76] : memref<3x128x128xf32, #tpu.memory_space<vmem>>, vector<1x128x128xf32>
    %113 = vector.shape_cast %112 : vector<1x128x128xf32> to vector<128x128xf32>
    %cst_77 = arith.constant dense<0.000000e+00> : vector<4x128xf32>
    %114 = tpu.matmul %111, %113, %cst_77 {dimension_numbers = #tpu.dot_dimension_numbers<[1], [0], [0], [1], [0, 0, 1, 1], [], []>} : vector<4x128xf32>, vector<128x128xf32>, vector<4x128xf32> -> vector<4x128xf32>
    %c1_78 = arith.constant 1 : index
    %c0_79 = arith.constant 0 : index
    %115 = vector.load %arg14[%c1_78, %c0_79] : memref<6x128xf32, #tpu.memory_space<vmem>>, vector<4x128xf32>
    %c1_80 = arith.constant 1 : index
    %c0_81 = arith.constant 0 : index
    %c0_82 = arith.constant 0 : index
    %116 = vector.load %arg10[%c1_80, %c0_81, %c0_82] : memref<3x128x128xf32, #tpu.memory_space<vmem>>, vector<1x128x128xf32>
    %117 = vector.shape_cast %116 : vector<1x128x128xf32> to vector<128x128xf32>
    %cst_83 = arith.constant dense<0.000000e+00> : vector<4x128xf32>
    %118 = tpu.matmul %115, %117, %cst_83 {dimension_numbers = #tpu.dot_dimension_numbers<[1], [0], [0], [1], [0, 0, 1, 1], [], []>} : vector<4x128xf32>, vector<128x128xf32>, vector<4x128xf32> -> vector<4x128xf32>
    %119 = arith.addf %114, %118 : vector<4x128xf32>
    %c2_84 = arith.constant 2 : index
    %c0_85 = arith.constant 0 : index
    %120 = vector.load %arg14[%c2_84, %c0_85] : memref<6x128xf32, #tpu.memory_space<vmem>>, vector<4x128xf32>
    %c2_86 = arith.constant 2 : index
    %c0_87 = arith.constant 0 : index
    %c0_88 = arith.constant 0 : index
    %121 = vector.load %arg10[%c2_86, %c0_87, %c0_88] : memref<3x128x128xf32, #tpu.memory_space<vmem>>, vector<1x128x128xf32>
    %122 = vector.shape_cast %121 : vector<1x128x128xf32> to vector<128x128xf32>
    %cst_89 = arith.constant dense<0.000000e+00> : vector<4x128xf32>
    %123 = tpu.matmul %120, %122, %cst_89 {dimension_numbers = #tpu.dot_dimension_numbers<[1], [0], [0], [1], [0, 0, 1, 1], [], []>} : vector<4x128xf32>, vector<128x128xf32>, vector<4x128xf32> -> vector<4x128xf32>
    %124 = arith.addf %119, %123 : vector<4x128xf32>
    %c0_90 = arith.constant 0 : index
    %c0_91 = arith.constant 0 : index
    %125 = vector.load %arg11[%c0_90, %c0_91] : memref<1x128xf32, #tpu.memory_space<vmem>>, vector<1x128xf32>
    %126 = vector.broadcast %125 : vector<1x128xf32> to vector<4x128xf32>
    %127 = arith.addf %124, %126 : vector<4x128xf32>
    %c0_92 = arith.constant 0 : index
    %c0_93 = arith.constant 0 : index
    %c0_94 = arith.constant 0 : index
    %128 = vector.load %arg12[%c0_92, %c0_93, %c0_94] : memref<1x4x128xf32, #tpu.memory_space<vmem>>, vector<1x4x128xf32>
    %129 = vector.shape_cast %128 : vector<1x4x128xf32> to vector<4x128xf32>
    %130 = vector.shape_cast %127 : vector<4x128xf32> to vector<1x4x128xf32>
    tpu.vector_store %arg12[%c0_92, %c0_93, %c0_94], %130 {strides = array<i32>} : memref<1x4x128xf32, #tpu.memory_space<vmem>>, vector<1x4x128xf32>,
    return
  }
  func.func @transform_0(%arg0: i32) -> (i32, i32, i32) {
    %c0_i32 = arith.constant 0 : i32
    %c0_i32_0 = arith.constant 0 : i32
    %c0_i32_1 = arith.constant 0 : i32
    return %arg0, %c0_i32, %c0_i32_0 : i32, i32, i32
  }
  func.func @transform_1(%arg0: i32) -> (i32, i32, i32) {
    %c0_i32 = arith.constant 0 : i32
    %c0_i32_0 = arith.constant 0 : i32
    %c0_i32_1 = arith.constant 0 : i32
    %c0_i32_2 = arith.constant 0 : i32
    return %c0_i32, %c0_i32_0, %c0_i32_1 : i32, i32, i32
  }
  func.func @transform_2(%arg0: i32) -> (i32, i32) {
    %c0_i32 = arith.constant 0 : i32
    %c0_i32_0 = arith.constant 0 : i32
    %c0_i32_1 = arith.constant 0 : i32
    return %c0_i32, %c0_i32_0 : i32, i32
  }
  func.func @transform_3(%arg0: i32) -> (i32, i32) {
    %c0_i32 = arith.constant 0 : i32
    %c0_i32_0 = arith.constant 0 : i32
    %c0_i32_1 = arith.constant 0 : i32
    return %c0_i32, %c0_i32_0 : i32, i32
  }
  func.func @transform_4(%arg0: i32) -> (i32, i32) {
    %c0_i32 = arith.constant 0 : i32
    %c0_i32_0 = arith.constant 0 : i32
    %c0_i32_1 = arith.constant 0 : i32
    return %c0_i32, %c0_i32_0 : i32, i32
  }
  func.func @transform_5(%arg0: i32) -> (i32, i32, i32) {
    %c0_i32 = arith.constant 0 : i32
    %c0_i32_0 = arith.constant 0 : i32
    %c0_i32_1 = arith.constant 0 : i32
    %c0_i32_2 = arith.constant 0 : i32
    return %c0_i32, %c0_i32_0, %c0_i32_1 : i32, i32, i32
  }
  func.func @transform_6(%arg0: i32) -> (i32, i32) {
    %c0_i32 = arith.constant 0 : i32
    %c0_i32_0 = arith.constant 0 : i32
    %c0_i32_1 = arith.constant 0 : i32
    return %c0_i32, %c0_i32_0 : i32, i32
  }
  func.func @transform_7(%arg0: i32) -> (i32, i32) {
    %c0_i32 = arith.constant 0 : i32
    %c0_i32_0 = arith.constant 0 : i32
    %c0_i32_1 = arith.constant 0 : i32
    return %c0_i32, %c0_i32_0 : i32, i32
  }
  func.func @transform_8(%arg0: i32) -> (i32, i32) {
    %c0_i32 = arith.constant 0 : i32
    %c0_i32_0 = arith.constant 0 : i32
    %c0_i32_1 = arith.constant 0 : i32
    return %c0_i32, %c0_i32_0 : i32, i32
  }
  func.func @transform_9(%arg0: i32) -> (i32, i32, i32) {
    %c0_i32 = arith.constant 0 : i32
    %c0_i32_0 = arith.constant 0 : i32
    %c0_i32_1 = arith.constant 0 : i32
    %c0_i32_2 = arith.constant 0 : i32
    return %c0_i32, %c0_i32_0, %c0_i32_1 : i32, i32, i32
  }
  func.func @transform_10(%arg0: i32) -> (i32, i32) {
    %c0_i32 = arith.constant 0 : i32
    %c0_i32_0 = arith.constant 0 : i32
    %c0_i32_1 = arith.constant 0 : i32
    return %c0_i32, %c0_i32_0 : i32, i32
  }
  func.func @transform_11(%arg0: i32) -> (i32, i32, i32) {
    %c0_i32 = arith.constant 0 : i32
    %c0_i32_0 = arith.constant 0 : i32
    %c0_i32_1 = arith.constant 0 : i32
    return %arg0, %c0_i32, %c0_i32_0 : i32, i32, i32
  }
}

</mosaic_0001>

<bundles_post_ra>
// kernel: encoder_pallas.1
= control target key start
LH: loop header
LB: loop body
LE: loop exit
PB: predicated region body
PF: predicated region fallthrough
CT: control target
= control target key end

     0   :  { %16 = vsyncpa [#allocation5], 0  ;;  %s2162_s0 = inlined_call_operand.vmem [shape: f32[2,18,128], index: 0, kind: input, shape index: {}]   ;;  %s2163_s1 = inlined_call_operand.hbm [shape: f32[3,128,256], index: 1, kind: input, shape index: {}]   ;;  %s2164_s2 = inlined_call_operand.vmem [shape: f32[1,256], index: 2, kind: input, shape index: {}]   ;;  %s2165_s3 = inlined_call_operand.vmem [shape: f32[8,128], index: 3, kind: input, shape index: {}]   ;;  %s2166_s4 = inlined_call_operand.vmem [shape: f32[8,128], index: 4, kind: input, shape index: {}]   ;;  %s2167_s5 = inlined_call_operand.hbm [shape: f32[3,128,256], index: 5, kind: input, shape index: {}]   ;;  %s2168_s6 = inlined_call_operand.vmem [shape: f32[1,256], index: 6, kind: input, shape index: {}]   ;;  %s2169_s7 = inlined_call_operand.vmem [shape: f32[4,128], index: 7, kind: input, shape index: {}]   ;;  %s2170_s8 = inlined_call_operand.vmem [shape: f32[4,128], index: 8, kind: input, shape index: {}]   ;;  %s2171_s9 = inlined_call_operand.hbm [shape: f32[3,128,128], index: 9, kind: input, shape index: {}]   ;;  %s2172_s10 = inlined_call_operand.vmem [shape: f32[1,128], index: 10, kind: input, shape index: {}]   ;;  %s2173_s11 = inlined_call_operand.vmem [shape: f32[2,4,128], index: 11, kind: output, shape index: {}]  }
   0x1   :  { %17 = vsyncpa [#allocation7], 0  ;;  %s1952_s17 = smov 0  }
   0x2 LB: > { %s1958_s18 = sadd.s32 4294967295, %s1881_s17   ;;  %p1545_p0 = scmp.ge.s32.totalorder %s1881_s17, 1  ;;  %s1881_s17 = sphi %s1952_s17, %s23_s17  }
   0x3   : > { %p290_p1 = scmp.lt.s32.totalorder %s1881_s17, 3  ;;  %p1754_p2 = scmp.eq.s32.totalorder %s1958_s18, 0 }
   0x4   : > { %s1883_s20 = smov [#allocation6]   ;;  %s1884_s22 = smov [#allocation4]  }
   0x5   : > { %p1963_p3 = pnand %p1545_p0, %p290_p1  ;;  %s324_s21 = sshll.u32 %s1883_s20, 4  ;;  %s325_s21 = int_to_ptr.vmem [resolvable:$true] %s324_s21 }
   0x6   : > { %s302_s23 = sshll.u32 %s1884_s22, 4  ;;  %s1885_s25 = smov [#allocation8]   ;;  %s1969_s23 = int_to_ptr.vmem [resolvable:$true] %s302_s23 }
   0x7   : > { %p1744_p4 = pneg %p1963_p3  ;;  %s346_s26 = sshll.u32 %s1885_s25, 4  ;;  %s1977_s26 = int_to_ptr.vmem [resolvable:$true] %s346_s26 }
   0x8   : > { %s1800_s27 = scalar_lea.vmem %s325_s21, 12288  ;;  %p1808_p10 = scmp.lt.s32.totalorder %s325_s21, %s325_s21 }
   0x9   : > { %p1973_p5 = pnand %p1754_p2, %p1744_p4  ;;  %p1801_p7 = scmp.ne.s32.totalorder %s325_s21, %s1800_s27 }
   0xa   : > { %p1809_p11 = scmp.lt.s32.totalorder %s1800_s27, %s1800_s27 }
   0xb   : > { %p1791_p6 = pneg %p1973_p5 }
   0xc   : > { %p1810_p12 = por %p1809_p11, %p1808_p10 }
   0xd   : > { %p1803_p8 = pnand %p1801_p7, %p1791_p6 }
   0xf   : > { %p1804_p9 = pneg %p1803_p8 }
  0x11   : > { %p1811_p13 = pnand %p1810_p12, %p1804_p9 }
  0x13   : > { %1814 = shalt.err (!%p1811_p13)
}
  0x14   : > { %s1886_s28 = smov 256   ;;  %s1887_s29 = smov 16  }
  0x15   : > { %1750 = dma.hbm_to_vmem [thread:$0]  (!%p1973_p5), %s2167_s5, 12288, %s325_s21, [#allocation7], %s1886_s28, %s1886_s28, %s1887_s29  }
  0x16   : > { %s1826_s13 = scalar_lea.vmem %s1969_s23, 12288  ;;  %p1834_p7 = scmp.lt.s32.totalorder %s1969_s23, %s1969_s23 }
  0x17   : > { %p1827_p0 = scmp.ne.s32.totalorder %s1969_s23, %s1826_s13  ;;  %p1835_p8 = scmp.lt.s32.totalorder %s1826_s13, %s1826_s13 }
  0x19   : > { %p1829_p1 = pnand %p1827_p0, %p1791_p6  ;;  %p1836_p9 = por %p1835_p8, %p1834_p7 }
  0x1b   : > { %p1830_p4 = pneg %p1829_p1 }
  0x1d   : > { %p1837_p10 = pnand %p1836_p9, %p1830_p4 }
  0x1f   : > { %1840 = shalt.err (!%p1837_p10)
}
  0x20   : > { %1747 = dma.hbm_to_vmem [thread:$0]  (!%p1973_p5), %s2163_s1, 12288, %s1969_s23, [#allocation5], %s1886_s28, %s1886_s28, %s1887_s29  }
  0x21   : > { %s1852_s16 = scalar_lea.vmem %s1977_s26, 6144  ;;  %p1860_p0 = scmp.lt.s32.totalorder %s1977_s26, %s1977_s26 }
  0x22   : > { %p1853_p11 = scmp.ne.s32.totalorder %s1977_s26, %s1852_s16  ;;  %p1861_p1 = scmp.lt.s32.totalorder %s1852_s16, %s1852_s16 }
  0x24   : > { %p1855_p12 = pnand %p1853_p11, %p1791_p6  ;;  %p1862_p4 = por %p1861_p1, %p1860_p0 }
  0x26   : > { %p1856_p13 = pneg %p1855_p12 }
  0x28   : > { %p1863_p7 = pnand %p1862_p4, %p1856_p13 }
  0x2a   : > { %1866 = shalt.err (!%p1863_p7)
}
  0x2b   : > { %s1888_s20 = smov 128   ;;  %s1889_s21 = smov 8  }
  0x2c   : > { %1753 = dma.hbm_to_vmem [thread:$0]  (!%p1973_p5), %s2171_s9, 6144, %s1977_s26, [#allocation7], %s1888_s20, %s1888_s20, %s1889_s21  }
  0x2d   : > { %373 = sbr.rel (%p1963_p3) target bundleno = 1834 (0x72a), region = 64 }
  0x32   : > { %1872 = dma.done.wait (%p1754_p2), [#allocation5], 12288  }
  0x33   : > { %1874 = vsyncadd (%p1754_p2), [#allocation5], 4294955008 }
  0x34   : > { %1876 = dma.done.wait (%p1754_p2), [#allocation7], 18432  }
  0x35   : > { %1878 = vsyncadd (%p1754_p2), [#allocation7], 4294948864  ;;  %v1890_v0 = vmov 0.0   ;;  %v496_v1 = vld [vmem:[#allocation4 + $0x1f8] sm:$0xff]  ;;  %v495_v3 = vld [vmem:[#allocation4 + $0x1f0] sm:$0xff]  ;;  %p420_p2 = scmp.lt.s32.totalorder %s1958_s18, 1 }
  0x36   : > { %561 = vmatprep.mubr.f32.mxu0 %v1890_v0  ;;  %805 = vst [vmem:[#allocation2] sm:$0xff] %v1890_v0  ;;  %806 = vst [vmem:[#allocation2 + $0x8] sm:$0x3] %v1890_v0  ;;  %632 = vmatprep.mubr.f32.mxu1 %v1890_v0  ;;  %v461_v2 = vld [vmem:[#allocation4 + $0xf8] sm:$0xff]  ;;  %v460_v4 = vld [vmem:[#allocation4 + $0xf0] sm:$0xff]  ;;  %vm1147_vm1 = vcmask 1043456  }
  0x37   : > { %1184 = vst [vmem:[#allocation3] sm:$0x3f] %v1890_v0  ;;  %497 = vmatprep.subr.mxu0 %v496_v1  ;;  %568 = vmatprep.subr.mxu1 %v461_v2  ;;  %v494_v5 = vld [vmem:[#allocation4 + $0x1e8] sm:$0xff]  ;;  %v493_v7 = vld [vmem:[#allocation4 + $0x1e0] sm:$0xff]  ;;  %v492_v9 = vld [vmem:[#allocation4 + $0x1d8] sm:$0xff]  ;;  %s2177_s18 = smov (!%p420_p2, %s1958_s18), 1 }
  0x38   : > { %v459_v6 = vld [vmem:[#allocation4 + $0xe8] sm:$0xff]  ;;  %498 = vmatpush1.msra.mxu0 %v495_v3  ;;  %569 = vmatpush1.msra.mxu1 %v460_v4  ;;  %v458_v8 = vld [vmem:[#allocation4 + $0xe0] sm:$0xff]  ;;  %v457_v10 = vld [vmem:[#allocation4 + $0xd8] sm:$0xff]  ;;  %s1719_s19 = smul.u32 24, %s2177_s18  ;;  %vm1891_vm2 = vmmov 0  }
  0x39   : > { %499 = vmatprep.subr.mxu0 %v494_v5  ;;  %570 = vmatprep.subr.mxu1 %v459_v6  ;;  %v491_v11 = vld [vmem:[#allocation4 + $0x1d0] sm:$0xff]  ;;  %v490_v13 = vld [vmem:[#allocation4 + $0x1c8] sm:$0xff]  ;;  %v489_v15 = vld [vmem:[#allocation4 + $0x1c0] sm:$0xff] }
  0x3a   : > { %v456_v12 = vld [vmem:[#allocation4 + $0xd0] sm:$0xff]  ;;  %500 = vmatpush1.msra.mxu0 %v493_v7  ;;  %571 = vmatpush1.msra.mxu1 %v458_v8  ;;  %v455_v14 = vld [vmem:[#allocation4 + $0xc8] sm:$0xff]  ;;  %v454_v16 = vld [vmem:[#allocation4 + $0xc0] sm:$0xff]  ;;  %s2040_s26 = scalar_lea.vmem %s2162_s0, %s1719_s19 }
  0x3b   : > { %501 = vmatprep.subr.mxu0 %v492_v9  ;;  %572 = vmatprep.subr.mxu1 %v457_v10  ;;  %v488_v17 = vld [vmem:[#allocation4 + $0x1b8] sm:$0xff]  ;;  %v487_v19 = vld [vmem:[#allocation4 + $0x1b0] sm:$0xff]  ;;  %v486_v21 = vld [vmem:[#allocation4 + $0x1a8] sm:$0xff] }
  0x3c   : > { %502 = vmatpush1.msra.mxu0 %v491_v11  ;;  %573 = vmatpush1.msra.mxu1 %v456_v12  ;;  %v453_v18 = vld [vmem:[#allocation4 + $0xb8] sm:$0xff]  ;;  %v452_v20 = vld [vmem:[#allocation4 + $0xb0] sm:$0xff]  ;;  %v451_v22 = vld [vmem:[#allocation4 + $0xa8] sm:$0xff] }
  0x3d   : > { %503 = vmatprep.subr.mxu0 %v490_v13  ;;  %574 = vmatprep.subr.mxu1 %v455_v14  ;;  %v485_v23 = vld [vmem:[#allocation4 + $0x1a0] sm:$0xff]  ;;  %v484_v25 = vld [vmem:[#allocation4 + $0x198] sm:$0xff]  ;;  %v483_v27 = vld [vmem:[#allocation4 + $0x190] sm:$0xff] }
  0x3e   : > { %504 = vmatpush1.msra.mxu0 %v489_v15  ;;  %575 = vmatpush1.msra.mxu1 %v454_v16  ;;  %v450_v24 = vld [vmem:[#allocation4 + $0xa0] sm:$0xff]  ;;  %v449_v26 = vld [vmem:[#allocation4 + $0x98] sm:$0xff]  ;;  %v448_v28 = vld [vmem:[#allocation4 + $0x90] sm:$0xff] }
  0x3f   : > { %505 = vmatprep.subr.mxu0 %v488_v17  ;;  %576 = vmatprep.subr.mxu1 %v453_v18  ;;  %v482_v29 = vld [vmem:[#allocation4 + $0x188] sm:$0xff]  ;;  %v481_v31 = vld [vmem:[#allocation4 + $0x180] sm:$0xff]  ;;  %v480_v33 = vld [vmem:[#allocation4 + $0x178] sm:$0xff] }
  0x40   : > { %506 = vmatpush1.msra.mxu0 %v487_v19  ;;  %577 = vmatpush1.msra.mxu1 %v452_v20  ;;  %v447_v30 = vld [vmem:[#allocation4 + $0x88] sm:$0xff]  ;;  %v446_v32 = vld [vmem:[#allocation4 + $0x80] sm:$0xff]  ;;  %v445_v34 = vld [vmem:[#allocation4 + $0x78] sm:$0xff] }
  0x41   : > { %507 = vmatprep.subr.mxu0 %v486_v21  ;;  %578 = vmatprep.subr.mxu1 %v451_v22  ;;  %v479_v35 = vld [vmem:[#allocation4 + $0x170] sm:$0xff]  ;;  %v478_v37 = vld [vmem:[#allocation4 + $0x168] sm:$0xff]  ;;  %v477_v39 = vld [vmem:[#allocation4 + $0x160] sm:$0xff] }
  0x42   : > { %508 = vmatpush1.msra.mxu0 %v485_v23  ;;  %579 = vmatpush1.msra.mxu1 %v450_v24  ;;  %v444_v36 = vld [vmem:[#allocation4 + $0x70] sm:$0xff]  ;;  %v443_v38 = vld [vmem:[#allocation4 + $0x68] sm:$0xff]  ;;  %v442_v40 = vld [vmem:[#allocation4 + $0x60] sm:$0xff] }
  0x43   : > { %509 = vmatprep.subr.mxu0 %v484_v25  ;;  %580 = vmatprep.subr.mxu1 %v449_v26  ;;  %v476_v41 = vld [vmem:[#allocation4 + $0x158] sm:$0xff]  ;;  %v475_v43 = vld [vmem:[#allocation4 + $0x150] sm:$0xff]  ;;  %v474_v45 = vld [vmem:[#allocation4 + $0x148] sm:$0xff] }
  0x44   : > { %510 = vmatpush1.msra.mxu0 %v483_v27  ;;  %581 = vmatpush1.msra.mxu1 %v448_v28  ;;  %v441_v42 = vld [vmem:[#allocation4 + $0x58] sm:$0xff]  ;;  %v440_v44 = vld [vmem:[#allocation4 + $0x50] sm:$0xff]  ;;  %v439_v46 = vld [vmem:[#allocation4 + $0x48] sm:$0xff] }
  0x45   : > { %511 = vmatprep.subr.mxu0 %v482_v29  ;;  %582 = vmatprep.subr.mxu1 %v447_v30  ;;  %v473_v47 = vld [vmem:[#allocation4 + $0x140] sm:$0xff]  ;;  %v472_v49 = vld [vmem:[#allocation4 + $0x138] sm:$0xff]  ;;  %v471_v51 = vld [vmem:[#allocation4 + $0x130] sm:$0xff] }
  0x46   : > { %512 = vmatpush1.msra.mxu0 %v481_v31  ;;  %583 = vmatpush1.msra.mxu1 %v446_v32  ;;  %v438_v48 = vld [vmem:[#allocation4 + $0x40] sm:$0xff]  ;;  %v437_v50 = vld [vmem:[#allocation4 + $0x38] sm:$0xff]  ;;  %v436_v52 = vld [vmem:[#allocation4 + $0x30] sm:$0xff] }
  0x47   : > { %513 = vmatprep.subr.mxu0 %v480_v33  ;;  %584 = vmatprep.subr.mxu1 %v445_v34  ;;  %v470_v53 = vld [vmem:[#allocation4 + $0x128] sm:$0xff]  ;;  %v469_v55 = vld [vmem:[#allocation4 + $0x120] sm:$0xff]  ;;  %v468_v57 = vld [vmem:[#allocation4 + $0x118] sm:$0xff] }
  0x48   : > { %514 = vmatpush1.msra.mxu0 %v479_v35  ;;  %585 = vmatpush1.msra.mxu1 %v444_v36  ;;  %v435_v54 = vld [vmem:[#allocation4 + $0x28] sm:$0xff]  ;;  %v434_v56 = vld [vmem:[#allocation4 + $0x20] sm:$0xff]  ;;  %v433_v58 = vld [vmem:[#allocation4 + $0x18] sm:$0xff] }
  0x49   : > { %515 = vmatprep.subr.mxu0 %v478_v37  ;;  %586 = vmatprep.subr.mxu1 %v443_v38  ;;  %v467_v59 = vld [vmem:[#allocation4 + $0x110] sm:$0xff]  ;;  %v466_v61 = vld [vmem:[#allocation4 + $0x108] sm:$0xff]  ;;  %v465_v63 = vld [vmem:[#allocation4 + $0x100] sm:$0xff]  ;;  %v749_v37 = vlaneseq }
  0x4a   : > { %516 = vmatpush1.msra.mxu0 %v477_v39  ;;  %587 = vmatpush1.msra.mxu1 %v442_v40  ;;  %v432_v60 = vld [vmem:[#allocation4 + $0x10] sm:$0xff]  ;;  %v431_v62 = vld [vmem:[#allocation4 + $0x8] sm:$0xff]  ;;  %v430_v1 = vld [vmem:[#allocation4] sm:$0xff] }
  0x4b   : > { %517 = vmatprep.subr.mxu0 %v476_v41  ;;  %588 = vmatprep.subr.mxu1 %v441_v42  ;;  %v1556_v2 = vld [vmem:[%s2040_s26 + $0x1] ss:$2 sm:$0xff]  ;;  %v429_v3 = vld [vmem:[%s2040_s26] ss:$2 sm:$0xff]  ;;  %v673_v4 = vld [vmem:[#allocation4 + $0x2f8] sm:$0xff]  ;;  %v2048_v40 = vshrl.u32 %v749_v37, 7 }
  0x4c   : > { %518 = vmatpush1.msra.mxu0 %v475_v43  ;;  %589 = vmatpush1.msra.mxu1 %v440_v44  ;;  %v672_v5 = vld [vmem:[#allocation4 + $0x2f0] sm:$0xff]  ;;  %v671_v6 = vld [vmem:[#allocation4 + $0x2e8] sm:$0xff]  ;;  %v670_v7 = vld [vmem:[#allocation4 + $0x2e0] sm:$0xff] }
  0x4d   : > { %519 = vmatprep.subr.mxu0 %v474_v45  ;;  %590 = vmatprep.subr.mxu1 %v439_v46  ;;  %v669_v8 = vld [vmem:[#allocation4 + $0x2d8] sm:$0xff]  ;;  %v668_v9 = vld [vmem:[#allocation4 + $0x2d0] sm:$0xff]  ;;  %v667_v10 = vld [vmem:[#allocation4 + $0x2c8] sm:$0xff]  ;;  %v755_v41 = vsub.s32 1, %v2048_v40 }
  0x4e   : > { %520 = vmatpush1.msra.mxu0 %v473_v47  ;;  %591 = vmatpush1.msra.mxu1 %v438_v48  ;;  %v666_v11 = vld [vmem:[#allocation4 + $0x2c0] sm:$0xff]  ;;  %v665_v12 = vld [vmem:[#allocation4 + $0x2b8] sm:$0xff]  ;;  %v664_v13 = vld [vmem:[#allocation4 + $0x2b0] sm:$0xff] }
  0x4f   : > { %521 = vmatprep.subr.mxu0 %v472_v49  ;;  %592 = vmatprep.subr.mxu1 %v437_v50  ;;  %v663_v14 = vld [vmem:[#allocation4 + $0x2a8] sm:$0xff]  ;;  %v662_v15 = vld [vmem:[#allocation4 + $0x2a0] sm:$0xff]  ;;  %v661_v16 = vld [vmem:[#allocation4 + $0x298] sm:$0xff] }
  0x50   : > { %522 = vmatpush1.msra.mxu0 %v471_v51  ;;  %593 = vmatpush1.msra.mxu1 %v436_v52  ;;  %v660_v17 = vld [vmem:[#allocation4 + $0x290] sm:$0xff]  ;;  %v659_v18 = vld [vmem:[#allocation4 + $0x288] sm:$0xff]  ;;  %v658_v19 = vld [vmem:[#allocation4 + $0x280] sm:$0xff] }
  0x51   : > { %523 = vmatprep.subr.mxu0 %v470_v53  ;;  %594 = vmatprep.subr.mxu1 %v435_v54  ;;  %v657_v20 = vld [vmem:[#allocation4 + $0x278] sm:$0xff]  ;;  %v656_v21 = vld [vmem:[#allocation4 + $0x270] sm:$0xff]  ;;  %v655_v22 = vld [vmem:[#allocation4 + $0x268] sm:$0xff]  ;;  %v751_v54 = vsub.s32 0, %v2048_v40 }
  0x52   : > { %524 = vmatpush1.msra.mxu0 %v469_v55  ;;  %595 = vmatpush1.msra.mxu1 %v434_v56  ;;  %v654_v23 = vld [vmem:[#allocation4 + $0x260] sm:$0xff]  ;;  %v653_v24 = vld [vmem:[#allocation4 + $0x258] sm:$0xff]  ;;  %v652_v25 = vld [vmem:[#allocation4 + $0x250] sm:$0xff] }
  0x53   : > { %525 = vmatprep.subr.mxu0 %v468_v57  ;;  %596 = vmatprep.subr.mxu1 %v433_v58  ;;  %v651_v26 = vld [vmem:[#allocation4 + $0x248] sm:$0xff]  ;;  %v650_v27 = vld [vmem:[#allocation4 + $0x240] sm:$0xff]  ;;  %v649_v28 = vld [vmem:[#allocation4 + $0x238] sm:$0xff] }
  0x54   : > { %526 = vmatpush1.msra.mxu0 %v467_v59  ;;  %597 = vmatpush1.msra.mxu1 %v432_v60  ;;  %v648_v29 = vld [vmem:[#allocation4 + $0x230] sm:$0xff]  ;;  %v647_v30 = vld [vmem:[#allocation4 + $0x228] sm:$0xff]  ;;  %v646_v31 = vld [vmem:[#allocation4 + $0x220] sm:$0xff] }
  0x55   : > { %527 = vmatprep.subr.mxu0 %v466_v61  ;;  %598 = vmatprep.subr.mxu1 %v431_v62  ;;  %v645_v32 = vld [vmem:[#allocation4 + $0x218] sm:$0xff]  ;;  %v644_v33 = vld [vmem:[#allocation4 + $0x210] sm:$0xff]  ;;  %v643_v34 = vld [vmem:[#allocation4 + $0x208] sm:$0xff] }
  0x56   : > { %528 = vmatpush1.msra.mxu0 %v465_v63  ;;  %599 = vmatpush1.msra.mxu1 %v430_v1  ;;  %v642_v35 = vld [vmem:[#allocation4 + $0x200] sm:$0xff]  ;;  %v1557_v36 = vld [vmem:[%s2040_s26 + $0x2] ss:$2 sm:$0xff]  ;;  %v747_v45 = vld [vmem:[%s2164_s2] sm:$0x3] }
  0x57   : > { %562 = vmatmul.mubr.f32.vlgmr.msra.gmra.mxu0 %v1556_v2  ;;  %633 = vmatmul.mubr.f32.vlgmr.msra.gmra.mxu1 %v429_v3  ;;  %v756_v47 = vrot.slane %v747_v45, %v755_v41  ;;  %v752_v57 = vrot.slane %v747_v45, %v751_v54 }
  0x58   : > { %674 = vmatprep.subr.mxu0 %v673_v4  ;;  %738 = vmatprep.mubr.f32.mxu0 %v1890_v0 }
  0x59   : > { %675 = vmatpush1.msra.mxu0 %v672_v5  ;;  %940 = vmatprep.mubr.f32.mxu1 %v1890_v0  ;;  %v2059_v5 = vand.u32 127, %v749_v37  ;;  %v827_v37 = vld [vmem:[#allocation6 + $0x90] sm:$0xff] }
  0x5a   : > { %676 = vmatprep.subr.mxu0 %v671_v6 }
  0x5b   : > { %677 = vmatpush1.msra.mxu0 %v670_v7  ;;  %vm780_vm0 = vcmp.lt.s32.totalorder %v2059_v5, 8  ;;  %v1200_v5 = vld [vmem:[#allocation8 + $0x68] sm:$0xff] }
  0x5c   : > { %678 = vmatprep.subr.mxu0 %v669_v8 }
  0x5d   : > { %679 = vmatpush1.msra.mxu0 %v668_v9 }
  0x5e   : > { %680 = vmatprep.subr.mxu0 %v667_v10  ;;  %v875_v10 = vld [vmem:[#allocation6 + $0x1f8] sm:$0xff] }
  0x5f   : > { %681 = vmatpush1.msra.mxu0 %v666_v11  ;;  %v874_v11 = vld [vmem:[#allocation6 + $0x1f0] sm:$0xff]  ;;  %876 = vmatprep.subr.mxu1 %v875_v10  ;;  %v849_v10 = vld [vmem:[#allocation6 + $0x128] sm:$0xff] }
  0x60   : > { %682 = vmatprep.subr.mxu0 %v665_v12  ;;  %v840_v12 = vld [vmem:[#allocation6 + $0xf8] sm:$0xff]  ;;  %877 = vmatpush1.msra.mxu1 %v874_v11  ;;  %v815_v11 = vld [vmem:[#allocation6 + $0x30] sm:$0xff] }
  0x61   : > { %683 = vmatpush1.msra.mxu0 %v664_v13  ;;  %v873_v13 = vld [vmem:[#allocation6 + $0x1e8] sm:$0xff] }
  0x62   : > { %684 = vmatprep.subr.mxu0 %v663_v14  ;;  %v839_v14 = vld [vmem:[#allocation6 + $0xf0] sm:$0xff]  ;;  %878 = vmatprep.subr.mxu1 %v873_v13  ;;  %v814_v13 = vld [vmem:[#allocation6 + $0x28] sm:$0xff] }
  0x63   : > { %685 = vmatpush1.msra.mxu0 %v662_v15  ;;  %v872_v15 = vld [vmem:[#allocation6 + $0x1e0] sm:$0xff] }
  0x64   : > { %686 = vmatprep.subr.mxu0 %v661_v16  ;;  %v838_v16 = vld [vmem:[#allocation6 + $0xe8] sm:$0xff]  ;;  %879 = vmatpush1.msra.mxu1 %v872_v15  ;;  %v813_v15 = vld [vmem:[#allocation6 + $0x20] sm:$0xff] }
  0x65   : > { %687 = vmatpush1.msra.mxu0 %v660_v17  ;;  %v871_v17 = vld [vmem:[#allocation6 + $0x1d8] sm:$0xff] }
  0x66   : > { %688 = vmatprep.subr.mxu0 %v659_v18  ;;  %v837_v18 = vld [vmem:[#allocation6 + $0xe0] sm:$0xff]  ;;  %880 = vmatprep.subr.mxu1 %v871_v17  ;;  %v812_v17 = vld [vmem:[#allocation6 + $0x18] sm:$0xff] }
  0x67   : > { %689 = vmatpush1.msra.mxu0 %v658_v19  ;;  %v870_v19 = vld [vmem:[#allocation6 + $0x1d0] sm:$0xff] }
  0x68   : > { %690 = vmatprep.subr.mxu0 %v657_v20  ;;  %v836_v20 = vld [vmem:[#allocation6 + $0xd8] sm:$0xff]  ;;  %881 = vmatpush1.msra.mxu1 %v870_v19  ;;  %v811_v19 = vld [vmem:[#allocation6 + $0x10] sm:$0xff] }
  0x69   : > { %691 = vmatpush1.msra.mxu0 %v656_v21  ;;  %v869_v21 = vld [vmem:[#allocation6 + $0x1c8] sm:$0xff] }
  0x6a   : > { %692 = vmatprep.subr.mxu0 %v655_v22  ;;  %v835_v22 = vld [vmem:[#allocation6 + $0xd0] sm:$0xff]  ;;  %882 = vmatprep.subr.mxu1 %v869_v21  ;;  %v810_v21 = vld [vmem:[#allocation6 + $0x8] sm:$0xff] }
  0x6b   : > { %693 = vmatpush1.msra.mxu0 %v654_v23  ;;  %v834_v23 = vld [vmem:[#allocation6 + $0xc8] sm:$0xff] }
  0x6c   : > { %694 = vmatprep.subr.mxu0 %v653_v24  ;;  %v868_v24 = vld [vmem:[#allocation6 + $0x1c0] sm:$0xff] }
  0x6d   : > { %695 = vmatpush1.msra.mxu0 %v652_v25  ;;  %v833_v25 = vld [vmem:[#allocation6 + $0xc0] sm:$0xff]  ;;  %883 = vmatpush1.msra.mxu1 %v868_v24 }
  0x6e   : > { %696 = vmatprep.subr.mxu0 %v651_v26  ;;  %v867_v26 = vld [vmem:[#allocation6 + $0x1b8] sm:$0xff] }
  0x6f   : > { %697 = vmatpush1.msra.mxu0 %v650_v27  ;;  %v832_v27 = vld [vmem:[#allocation6 + $0xb8] sm:$0xff]  ;;  %884 = vmatprep.subr.mxu1 %v867_v26 }
  0x70   : > { %698 = vmatprep.subr.mxu0 %v649_v28  ;;  %v866_v28 = vld [vmem:[#allocation6 + $0x1b0] sm:$0xff] }
  0x71   : > { %699 = vmatpush1.msra.mxu0 %v648_v29  ;;  %v831_v29 = vld [vmem:[#allocation6 + $0xb0] sm:$0xff]  ;;  %885 = vmatpush1.msra.mxu1 %v866_v28 }
  0x72   : > { %700 = vmatprep.subr.mxu0 %v647_v30  ;;  %v865_v30 = vld [vmem:[#allocation6 + $0x1a8] sm:$0xff] }
  0x73   : > { %701 = vmatpush1.msra.mxu0 %v646_v31  ;;  %v830_v31 = vld [vmem:[#allocation6 + $0xa8] sm:$0xff]  ;;  %886 = vmatprep.subr.mxu1 %v865_v30 }
  0x74   : > { %702 = vmatprep.subr.mxu0 %v645_v32  ;;  %v864_v32 = vld [vmem:[#allocation6 + $0x1a0] sm:$0xff] }
  0x75   : > { %703 = vmatpush1.msra.mxu0 %v644_v33  ;;  %v829_v33 = vld [vmem:[#allocation6 + $0xa0] sm:$0xff]  ;;  %887 = vmatpush1.msra.mxu1 %v864_v32  ;;  %v1051_v32 = vld [vmem:[#allocation6 + $0x2f0] sm:$0xff] }
  0x76   : > { %704 = vmatprep.subr.mxu0 %v643_v34  ;;  %v863_v34 = vld [vmem:[#allocation6 + $0x198] sm:$0xff] }
  0x77   : > { %705 = vmatpush1.msra.mxu0 %v642_v35  ;;  %v828_v35 = vld [vmem:[#allocation6 + $0x98] sm:$0xff]  ;;  %888 = vmatprep.subr.mxu1 %v863_v34 }
  0x78   : > { %739 = vmatmul.mubr.f32.vlgmr.msra.gmra.mxu0 %v1557_v36  ;;  %947 = vmatprep.subr.mxu0 %v840_v12  ;;  %v862_v36 = vld [vmem:[#allocation6 + $0x190] sm:$0xff]  ;;  %v848_v12 = vld [vmem:[#allocation6 + $0x120] sm:$0xff] }
  0x79   : > { %1011 = vmatprep.mubr.f32.mxu0 %v1890_v0  ;;  %948 = vmatpush1.msra.mxu0 %v839_v14  ;;  %v847_v14 = vld [vmem:[#allocation6 + $0x118] sm:$0xff] }
  0x7a   : > { %949 = vmatprep.subr.mxu0 %v838_v16  ;;  %889 = vmatpush1.msra.mxu1 %v862_v36  ;;  %v846_v16 = vld [vmem:[#allocation6 + $0x110] sm:$0xff]  ;;  %v1049_v36 = vld [vmem:[#allocation6 + $0x2e0] sm:$0xff] }
  0x7b   : > { %950 = vmatpush1.msra.mxu0 %v837_v18  ;;  %v845_v18 = vld [vmem:[#allocation6 + $0x108] sm:$0xff] }
  0x7c   : > { %951 = vmatprep.subr.mxu0 %v836_v20  ;;  %v844_v20 = vld [vmem:[#allocation6 + $0x100] sm:$0xff] }
  0x7d   : > { %952 = vmatpush1.msra.mxu0 %v835_v22  ;;  %v809_v22 = vld [vmem:[#allocation6] sm:$0xff] }
  0x7e   : > { %953 = vmatprep.subr.mxu0 %v834_v23  ;;  %v1052_v23 = vld [vmem:[#allocation6 + $0x2f8] sm:$0xff] }
  0x7f   : > { %954 = vmatpush1.msra.mxu0 %v833_v25 }
  0x80   : > { %955 = vmatprep.subr.mxu0 %v832_v27  ;;  %v801_v27 = vld [vmem:[%s2165_s3] sm:$0xff] }
  0x81   : > { %956 = vmatpush1.msra.mxu0 %v831_v29  ;;  %v803_v29 = vld [vmem:[%s2166_s4] sm:$0xff] }
  0x82   : > { %957 = vmatprep.subr.mxu0 %v830_v31 }
  0x83   : > { %958 = vmatpush1.msra.mxu0 %v829_v33  ;;  %v1050_v33 = vld [vmem:[#allocation6 + $0x2e8] sm:$0xff] }
  0x84   : > { %959 = vmatprep.subr.mxu0 %v828_v35 }
  0x85   : > { %960 = vmatpush1.msra.mxu0 %v827_v37  ;;  %v1048_v37 = vld [vmem:[#allocation6 + $0x2d8] sm:$0xff] }
 0x117   : > { %v563_v38 = vpop.f32.mrf.mxu0  ;;  %v634_v39 = vpop.f32.mrf.mxu1 }
 0x118   : > { %v635_v55 = vadd.f32 %v634_v39, %v563_v38  ;;  %v861_v38 = vld [vmem:[#allocation6 + $0x188] sm:$0xff] }
 0x119   : > { %v565_v42 = vpop.f32.mrf.mxu0  ;;  %v636_v43 = vpop.f32.mrf.mxu1  ;;  %v826_v39 = vld [vmem:[#allocation6 + $0x88] sm:$0xff]  ;;  %890 = vmatprep.subr.mxu1 %v861_v38 }
 0x11a   : > { %v637_v46 = vadd.f32 %v636_v43, %v565_v42  ;;  %v860_v42 = vld [vmem:[#allocation6 + $0x180] sm:$0xff]  ;;  %961 = vmatprep.subr.mxu0 %v826_v39  ;;  %v1046_v38 = vld [vmem:[#allocation6 + $0x2c8] sm:$0xff] }
 0x11b   : > { %v825_v43 = vld [vmem:[#allocation6 + $0x80] sm:$0xff]  ;;  %891 = vmatpush1.msra.mxu1 %v860_v42  ;;  %v1044_v42 = vld [vmem:[#allocation6 + $0x2b8] sm:$0xff] }
 0x11c   : > { %962 = vmatpush1.msra.mxu0 %v825_v43  ;;  %v1045_v39 = vld [vmem:[#allocation6 + $0x2c0] sm:$0xff]  ;;  %v1043_v43 = vld [vmem:[#allocation6 + $0x2b0] sm:$0xff] }
 0x138   : > { %v740_v44 = vpop.f32.mrf.mxu0 }
 0x139   : > { %v745_v56 = vadd.f32 %v740_v44, %v635_v55  ;;  %v859_v44 = vld [vmem:[#allocation6 + $0x178] sm:$0xff] }
 0x13a   : > { %v742_v48 = vpop.f32.mrf.mxu0  ;;  %892 = vmatprep.subr.mxu1 %v859_v44  ;;  %v1042_v44 = vld [vmem:[#allocation6 + $0x2a8] sm:$0xff] }
 0x13b   : > { %v746_v49 = vadd.f32 %v742_v48, %v637_v46  ;;  %v759_v58 = vadd.f32 %v752_v57, %v745_v56  ;;  %v824_v48 = vld [vmem:[#allocation6 + $0x78] sm:$0xff]  ;;  %v821_v57 = vld [vmem:[#allocation6 + $0x60] sm:$0xff] }
 0x13c   : > { %963 = vmatprep.subr.mxu0 %v824_v48  ;;  %v855_v56 = vld [vmem:[#allocation6 + $0x158] sm:$0xff]  ;;  %v1038_v48 = vld [vmem:[#allocation6 + $0x288] sm:$0xff] }
 0x13d   : > { %v760_v50 = vadd.f32 %v756_v47, %v746_v49  ;;  %v858_v47 = vld [vmem:[#allocation6 + $0x170] sm:$0xff] }
 0x13e   : > { %893 = vmatpush1.msra.mxu1 %v858_v47  ;;  %v1039_v47 = vld [vmem:[#allocation6 + $0x290] sm:$0xff] }
 0x13f   : > { %v1558_v51 = vmul.f32 -1.442695, %v760_v50  ;;  %v857_v50 = vld [vmem:[#allocation6 + $0x168] sm:$0xff] }
 0x140   : > { %894 = vmatprep.subr.mxu1 %v857_v50  ;;  %v1036_v50 = vld [vmem:[#allocation6 + $0x278] sm:$0xff] }
 0x141   : > { %1777 = vpow2.f32 %v1558_v51  ;;  %v823_v51 = vld [vmem:[#allocation6 + $0x70] sm:$0xff] }
 0x142   : > { %964 = vmatpush1.msra.mxu0 %v823_v51  ;;  %v1035_v51 = vld [vmem:[#allocation6 + $0x270] sm:$0xff] }
 0x14e   : > { %v1778_v52 = vpop.eup %1777 }
 0x14f   : > { %v764_v53 = vadd.f32 1.0, %v1778_v52  ;;  %v856_v52 = vld [vmem:[#allocation6 + $0x160] sm:$0xff] }
 0x150   : > { %895 = vmatpush1.msra.mxu1 %v856_v52  ;;  %v1034_v52 = vld [vmem:[#allocation6 + $0x268] sm:$0xff] }
 0x151   : > { %1779 = vrcp.f32 %v764_v53  ;;  %v822_v53 = vld [vmem:[#allocation6 + $0x68] sm:$0xff]  ;;  %896 = vmatprep.subr.mxu1 %v855_v56  ;;  %v1031_v56 = vld [vmem:[#allocation6 + $0x250] sm:$0xff] }
 0x152   : > { %965 = vmatprep.subr.mxu0 %v822_v53  ;;  %v1033_v53 = vld [vmem:[#allocation6 + $0x260] sm:$0xff] }
 0x153   : > { %966 = vmatpush1.msra.mxu0 %v821_v57  ;;  %v1030_v57 = vld [vmem:[#allocation6 + $0x248] sm:$0xff] }
 0x15e   : > { %v1780_v59 = vpop.eup %1779 }
 0x15f   : > { %v767_v60 = vmul.f32 %v1780_v59, %v759_v58  ;;  %v854_v58 = vld [vmem:[#allocation6 + $0x150] sm:$0xff]  ;;  %v820_v59 = vld [vmem:[#allocation6 + $0x58] sm:$0xff] }
 0x160   : > { %897 = vmatpush1.msra.mxu1 %v854_v58  ;;  %967 = vmatprep.subr.mxu0 %v820_v59  ;;  %v1029_v58 = vld [vmem:[#allocation6 + $0x240] sm:$0xff]  ;;  %v1028_v59 = vld [vmem:[#allocation6 + $0x238] sm:$0xff] }
 0x161   : > { %768 = vadd.xlane.f32.xlu0 %v767_v60 }
 0x1ea   : > { %v769_v61 = vpop.xlane.xlu0 %768 }
 0x1eb   : > { %v770_v62 = vrot.slane %v769_v61, 4 }
 0x1ed   : > { %v771_v63 = vadd.f32 %v770_v62, %v769_v61  ;;  %v853_v61 = vld [vmem:[#allocation6 + $0x148] sm:$0xff]  ;;  %v819_v62 = vld [vmem:[#allocation6 + $0x50] sm:$0xff] }
 0x1ee   : > { %898 = vmatprep.subr.mxu1 %v853_v61  ;;  %968 = vmatpush1.msra.mxu0 %v819_v62  ;;  %v1026_v61 = vld [vmem:[#allocation6 + $0x228] sm:$0xff]  ;;  %v1025_v62 = vld [vmem:[#allocation6 + $0x220] sm:$0xff] }
 0x1ef   : > { %v772_v1 = vrot.slane %v771_v63, 2 }
 0x1f1   : > { %v773_v2 = vadd.f32 %v772_v1, %v771_v63  ;;  %v852_v63 = vld [vmem:[#allocation6 + $0x140] sm:$0xff]  ;;  %v818_v1 = vld [vmem:[#allocation6 + $0x48] sm:$0xff] }
 0x1f2   : > { %899 = vmatpush1.msra.mxu1 %v852_v63  ;;  %969 = vmatprep.subr.mxu0 %v818_v1  ;;  %v1024_v63 = vld [vmem:[#allocation6 + $0x218] sm:$0xff]  ;;  %v1023_v1 = vld [vmem:[#allocation6 + $0x210] sm:$0xff] }
 0x1f3   : > { %v774_v3 = vrot.slane %v773_v2, 1 }
 0x1f5   : > { %v775_v4 = vadd.f32 %v774_v3, %v773_v2  ;;  %v851_v3 = vld [vmem:[#allocation6 + $0x138] sm:$0xff] }
 0x1f6   : > { %900 = vmatprep.subr.mxu1 %v851_v3  ;;  %v1021_v3 = vld [vmem:[#allocation6 + $0x200] sm:$0xff] }
 0x1f7   : > { %1720 = vpush %v775_v4  ;;  %v817_v4 = vld [vmem:[#allocation6 + $0x40] sm:$0xff] }
 0x1f8   : > { %970 = vmatpush1.msra.mxu0 %v817_v4 }
 0x228   : > { %s1721_s29 = spop %1720 }
 0x229   : > { %s777_s30 = smul.f32 0.015625, %s1721_s29 }
 0x22b   : > { %v781_v6 = vstv %s777_s30 }
 0x22c   : > { %v782_v7 = vsub.f32 %v767_v60, %v781_v6  ;;  %v850_v6 = vld [vmem:[#allocation6 + $0x130] sm:$0xff] }
 0x22d   : > { %901 = vmatpush1.msra.mxu1 %v850_v6 }
 0x22e   : > { %v2064_v8 = vsel %vm780_vm0, %v782_v7, 0.0  ;;  %v816_v7 = vld [vmem:[#allocation6 + $0x38] sm:$0xff]  ;;  %902 = vmatprep.subr.mxu1 %v849_v10 }
 0x22f   : > { %v784_v9 = vmul.f32 %v2064_v8, %v2064_v8  ;;  %971 = vmatprep.subr.mxu0 %v816_v7  ;;  %903 = vmatpush1.msra.mxu1 %v848_v12  ;;  %v1126_v12 = vld [vmem:[%s2168_s6] sm:$0x3] }
 0x230   : > { %972 = vmatpush1.msra.mxu0 %v815_v11  ;;  %904 = vmatprep.subr.mxu1 %v847_v14  ;;  %v1135_v14 = vrot.slane %v1126_v12, %v755_v41 }
 0x231   : > { %785 = vadd.xlane.f32.xlu0 %v784_v9  ;;  %973 = vmatprep.subr.mxu0 %v814_v13 }
 0x232   : > { %974 = vmatpush1.msra.mxu0 %v813_v15  ;;  %905 = vmatpush1.msra.mxu1 %v846_v16 }
 0x233   : > { %975 = vmatprep.subr.mxu0 %v812_v17  ;;  %906 = vmatprep.subr.mxu1 %v845_v18 }
 0x234   : > { %976 = vmatpush1.msra.mxu0 %v811_v19  ;;  %907 = vmatpush1.msra.mxu1 %v844_v20 }
 0x235   : > { %977 = vmatprep.subr.mxu0 %v810_v21  ;;  %1053 = vmatprep.subr.mxu1 %v1052_v23  ;;  %v1131_v23 = vrot.slane %v1126_v12, %v751_v54  ;;  %v1206_v12 = vld [vmem:[#allocation8 + $0x88] sm:$0xff] }
 0x236   : > { %978 = vmatpush1.msra.mxu0 %v809_v22 }
 0x237   : > { %1614 = vmatprep.subr.mxu0 %v1890_v0 }
 0x2ba   : > { %v786_v45 = vpop.xlane.xlu0 %785 }
 0x2bb   : > { %v787_v46 = vrot.slane %v786_v45, 4 }
 0x2bd   : > { %v788_v49 = vadd.f32 %v787_v46, %v786_v45  ;;  %v1041_v45 = vld [vmem:[#allocation6 + $0x2a0] sm:$0xff]  ;;  %v1040_v46 = vld [vmem:[#allocation6 + $0x298] sm:$0xff] }
 0x2bf   : > { %v789_v55 = vrot.slane %v788_v49, 2 }
 0x2c1   : > { %v790_v60 = vadd.f32 %v789_v55, %v788_v49  ;;  %v1037_v49 = vld [vmem:[#allocation6 + $0x280] sm:$0xff]  ;;  %v1032_v55 = vld [vmem:[#allocation6 + $0x258] sm:$0xff] }
 0x2c3   : > { %v791_v2 = vrot.slane %v790_v60, 1 }
 0x2c5   : > { %v792_v9 = vadd.f32 %v791_v2, %v790_v60  ;;  %v1027_v60 = vld [vmem:[#allocation6 + $0x230] sm:$0xff]  ;;  %v1022_v2 = vld [vmem:[#allocation6 + $0x208] sm:$0xff] }
 0x2c7   : > { %1722 = vpush %v792_v9 }
 0x2f8   : > { %s1723_s12 = spop %1722 }
 0x2f9   : > { %s794_s13 = smul.f32 0.015625, %s1723_s12 }
 0x2fb   : > { %s795_s14 = sadd.f32 1e-05, %s794_s13 }
 0x2fd   : > { %v796_v24 = vstv %s795_s14 }
 0x2fe   : > { %1781 = vrsqrt.f32 %v796_v24 }
 0x30b   : > { %v1782_v25 = vpop.eup %1781 }
 0x30c   : > { %1724 = vpush %v1782_v25 }
 0x33d   : > { %s1725_s15 = spop %1724 }
 0x33e   : > { %v799_v26 = vstv %s1725_s15  ;;  %s1555_s15 = sshll.u32 %s2177_s18, 2 }
 0x33f   : > { %v800_v28 = vmul.f32 %v799_v26, %v2064_v8  ;;  %v1047_v8 = vld [vmem:[#allocation6 + $0x2d0] sm:$0xff]  ;;  %s428_s25 = scalar_lea.vmem %s2173_s11, %s1555_s15 }
 0x341   : > { %v802_v30 = vmul.f32 %v801_v27, %v800_v28 }
 0x343   : > { %v804_v31 = vadd.f32 %v803_v29, %v802_v30 }
 0x345   : > { %807 = vst [vmem:[#allocation2 + $0x1] sm:$0xff] %v804_v31 }
 0x34c   : > { %v842_v34 = vld [vmem:[#allocation2 + $0x1] ss:$2 sm:$0xf]  ;;  %v808_v35 = vld [vmem:[#allocation2] ss:$2 sm:$0xf] }
 0x34d   : > { %941 = vmatmul.mubr.f32.vlgmr.msra.gmra.mxu1 %v842_v34  ;;  %1012 = vmatmul.mubr.f32.vlgmr.msra.gmra.mxu0 %v808_v35  ;;  %v1019_v4 = vld [vmem:[#allocation2 + $0x2] ss:$2 sm:$0xf] }
 0x34e   : > { %1054 = vmatpush1.msra.mxu1 %v1051_v32  ;;  %1117 = vmatprep.mubr.f32.mxu1 %v1890_v0 }
 0x34f   : > { %1055 = vmatprep.subr.mxu1 %v1050_v33  ;;  %1646 = vmatprep.mubr.msk.f32.mxu0 %vm1891_vm2, %v1890_v0 }
 0x350   : > { %1056 = vmatpush1.msra.mxu1 %v1049_v36 }
 0x351   : > { %1057 = vmatprep.subr.mxu1 %v1048_v37  ;;  %v1220_v37 = vld [vmem:[#allocation8 + $0xf8] sm:$0xff] }
 0x352   : > { %1058 = vmatpush1.msra.mxu1 %v1047_v8  ;;  %v1202_v8 = vld [vmem:[#allocation8 + $0x78] sm:$0xff]  ;;  %1615 = vmatpush3.msra.mxu0 %v1220_v37  ;;  %v1364_v37 = vld [vmem:[#allocation8 + $0x108] sm:$0xff] }
 0x353   : > { %1059 = vmatprep.subr.mxu1 %v1046_v38  ;;  %v1219_v38 = vld [vmem:[#allocation8 + $0xf0] sm:$0xff]  ;;  %1616 = vmatprep.subr.mxu0 %v1890_v0 }
 0x354   : > { %1060 = vmatpush1.msra.mxu1 %v1045_v39  ;;  %v1201_v39 = vld [vmem:[#allocation8 + $0x70] sm:$0xff]  ;;  %1617 = vmatpush3.msra.mxu0 %v1219_v38 }
 0x355   : > { %1061 = vmatprep.subr.mxu1 %v1044_v42  ;;  %v1218_v42 = vld [vmem:[#allocation8 + $0xe8] sm:$0xff]  ;;  %1618 = vmatprep.subr.mxu0 %v1890_v0 }
 0x356   : > { %1062 = vmatpush1.msra.mxu1 %v1043_v43  ;;  %v1217_v43 = vld [vmem:[#allocation8 + $0xe0] sm:$0xff]  ;;  %1619 = vmatpush3.msra.mxu0 %v1218_v42 }
 0x357   : > { %1063 = vmatprep.subr.mxu1 %v1042_v44  ;;  %v1199_v44 = vld [vmem:[#allocation8 + $0x60] sm:$0xff]  ;;  %1620 = vmatprep.subr.mxu0 %v1890_v0 }
 0x358   : > { %1064 = vmatpush1.msra.mxu1 %v1041_v45  ;;  %v1216_v45 = vld [vmem:[#allocation8 + $0xd8] sm:$0xff]  ;;  %1621 = vmatpush3.msra.mxu0 %v1217_v43 }
 0x359   : > { %1065 = vmatprep.subr.mxu1 %v1040_v46  ;;  %v1198_v46 = vld [vmem:[#allocation8 + $0x58] sm:$0xff]  ;;  %1622 = vmatprep.subr.mxu0 %v1890_v0 }
 0x35a   : > { %1066 = vmatpush1.msra.mxu1 %v1039_v47  ;;  %v1215_v47 = vld [vmem:[#allocation8 + $0xd0] sm:$0xff]  ;;  %1623 = vmatpush3.msra.mxu0 %v1216_v45 }
 0x35b   : > { %1067 = vmatprep.subr.mxu1 %v1038_v48  ;;  %v1197_v48 = vld [vmem:[#allocation8 + $0x50] sm:$0xff]  ;;  %1624 = vmatprep.subr.mxu0 %v1890_v0 }
 0x35c   : > { %1068 = vmatpush1.msra.mxu1 %v1037_v49  ;;  %v1214_v49 = vld [vmem:[#allocation8 + $0xc8] sm:$0xff]  ;;  %1625 = vmatpush3.msra.mxu0 %v1215_v47 }
 0x35d   : > { %1069 = vmatprep.subr.mxu1 %v1036_v50  ;;  %v1196_v50 = vld [vmem:[#allocation8 + $0x48] sm:$0xff]  ;;  %1626 = vmatprep.subr.mxu0 %v1890_v0 }
 0x35e   : > { %1070 = vmatpush1.msra.mxu1 %v1035_v51  ;;  %v1213_v51 = vld [vmem:[#allocation8 + $0xc0] sm:$0xff]  ;;  %1627 = vmatpush3.msra.mxu0 %v1214_v49 }
 0x35f   : > { %1071 = vmatprep.subr.mxu1 %v1034_v52  ;;  %v1195_v52 = vld [vmem:[#allocation8 + $0x40] sm:$0xff]  ;;  %1628 = vmatprep.subr.mxu0 %v1890_v0 }
 0x360   : > { %1072 = vmatpush1.msra.mxu1 %v1033_v53  ;;  %1629 = vmatpush3.msra.mxu0 %v1213_v51 }
 0x361   : > { %1073 = vmatprep.subr.mxu1 %v1032_v55  ;;  %1630 = vmatprep.subr.mxu0 %v1890_v0 }
 0x362   : > { %1074 = vmatpush1.msra.mxu1 %v1031_v56  ;;  %v1212_v56 = vld [vmem:[#allocation8 + $0xb8] sm:$0xff] }
 0x363   : > { %1075 = vmatprep.subr.mxu1 %v1030_v57  ;;  %1631 = vmatpush3.msra.mxu0 %v1212_v56 }
 0x364   : > { %1076 = vmatpush1.msra.mxu1 %v1029_v58  ;;  %v1194_v58 = vld [vmem:[#allocation8 + $0x38] sm:$0xff]  ;;  %1632 = vmatprep.subr.mxu0 %v1890_v0 }
 0x365   : > { %1077 = vmatprep.subr.mxu1 %v1028_v59  ;;  %v1211_v59 = vld [vmem:[#allocation8 + $0xb0] sm:$0xff] }
 0x366   : > { %1078 = vmatpush1.msra.mxu1 %v1027_v60  ;;  %1633 = vmatpush3.msra.mxu0 %v1211_v59 }
 0x367   : > { %1079 = vmatprep.subr.mxu1 %v1026_v61  ;;  %v1193_v61 = vld [vmem:[#allocation8 + $0x30] sm:$0xff]  ;;  %1634 = vmatprep.subr.mxu0 %v1890_v0 }
 0x368   : > { %1080 = vmatpush1.msra.mxu1 %v1025_v62  ;;  %v1210_v62 = vld [vmem:[#allocation8 + $0xa8] sm:$0xff] }
 0x369   : > { %1081 = vmatprep.subr.mxu1 %v1024_v63  ;;  %1635 = vmatpush3.msra.mxu0 %v1210_v62 }
 0x36a   : > { %1082 = vmatpush1.msra.mxu1 %v1023_v1  ;;  %v1192_v1 = vld [vmem:[#allocation8 + $0x28] sm:$0xff]  ;;  %1636 = vmatprep.subr.mxu0 %v1890_v0 }
 0x36b   : > { %1083 = vmatprep.subr.mxu1 %v1022_v2  ;;  %v1209_v2 = vld [vmem:[#allocation8 + $0xa0] sm:$0xff] }
 0x36c   : > { %1084 = vmatpush1.msra.mxu1 %v1021_v3  ;;  %1637 = vmatpush3.msra.mxu0 %v1209_v2 }
 0x36d   : > { %1118 = vmatmul.mubr.f32.vlgmr.msra.gmra.mxu1 %v1019_v4  ;;  %1649 = vmatprep.subr.mxu1 %v1890_v0  ;;  %v1191_v4 = vld [vmem:[#allocation8 + $0x20] sm:$0xff] }
 0x36e   : > { %1650 = vmatpush3.msra.mxu1 %v1202_v8  ;;  %1638 = vmatprep.subr.mxu0 %v1890_v0  ;;  %v1363_v8 = vld [vmem:[#allocation8 + $0x100] sm:$0xff] }
 0x36f   : > { %1651 = vmatprep.subr.mxu1 %v1890_v0  ;;  %1681 = vmatprep.mubr.msk.f32.mxu1 %vm1891_vm2, %v1890_v0 }
 0x370   : > { %1652 = vmatpush3.msra.mxu1 %v1201_v39 }
 0x371   : > { %1653 = vmatprep.subr.mxu1 %v1890_v0 }
 0x372   : > { %1654 = vmatpush3.msra.mxu1 %v1200_v5 }
 0x373   : > { %1655 = vmatprep.subr.mxu1 %v1890_v0 }
 0x374   : > { %1656 = vmatpush3.msra.mxu1 %v1199_v44 }
 0x375   : > { %1657 = vmatprep.subr.mxu1 %v1890_v0 }
 0x376   : > { %1658 = vmatpush3.msra.mxu1 %v1198_v46  ;;  %v1560_v46 = vld [vmem:[%s2172_s10] ss:$0 sm:$0xff] }
 0x377   : > { %1659 = vmatprep.subr.mxu1 %v1890_v0 }
 0x378   : > { %1660 = vmatpush3.msra.mxu1 %v1197_v48 }
 0x379   : > { %1661 = vmatprep.subr.mxu1 %v1890_v0 }
 0x37a   : > { %1662 = vmatpush3.msra.mxu1 %v1196_v50 }
 0x37b   : > { %1663 = vmatprep.subr.mxu1 %v1890_v0 }
 0x37c   : > { %1664 = vmatpush3.msra.mxu1 %v1195_v52 }
 0x37d   : > { %1665 = vmatprep.subr.mxu1 %v1890_v0 }
 0x37e   : > { %1666 = vmatpush3.msra.mxu1 %v1194_v58 }
 0x37f   : > { %1667 = vmatprep.subr.mxu1 %v1890_v0 }
 0x380   : > { %1668 = vmatpush3.msra.mxu1 %v1193_v61 }
 0x381   : > { %1669 = vmatprep.subr.mxu1 %v1890_v0 }
 0x382   : > { %1670 = vmatpush3.msra.mxu1 %v1192_v1 }
 0x383   : > { %1671 = vmatprep.subr.mxu1 %v1890_v0 }
 0x384   : > { %1672 = vmatpush3.msra.mxu1 %v1191_v4 }
 0x385   : > { %1673 = vmatprep.subr.mxu1 %v1890_v0 }
 0x40d   : > { %v942_v6 = vpop.f32.mrf.mxu1  ;;  %v1013_v7 = vpop.f32.mrf.mxu0 }
 0x40e   : > { %v1014_v21 = vadd.f32 %v1013_v7, %v942_v6  ;;  %v1208_v6 = vld [vmem:[#allocation8 + $0x98] sm:$0xff] }
 0x40f   : > { %v944_v9 = vpop.f32.mrf.mxu1  ;;  %v1015_v10 = vpop.f32.mrf.mxu0  ;;  %1639 = vmatpush3.msra.mxu0 %v1208_v6 }
 0x410   : > { %v1016_v13 = vadd.f32 %v1015_v10, %v944_v9  ;;  %v1190_v9 = vld [vmem:[#allocation8 + $0x18] sm:$0xff]  ;;  %v1207_v10 = vld [vmem:[#allocation8 + $0x90] sm:$0xff]  ;;  %1640 = vmatprep.subr.mxu0 %v1890_v0 }
 0x411   : > { %1674 = vmatpush3.msra.mxu1 %v1190_v9  ;;  %1641 = vmatpush3.msra.mxu0 %v1207_v10 }
 0x412   : > { %1675 = vmatprep.subr.mxu1 %v1890_v0  ;;  %1642 = vmatprep.subr.mxu0 %v1890_v0 }
 0x413   : > { %1643 = vmatpush3.msra.mxu0 %v1206_v12 }
 0x414   : > { %1644 = vmatprep.subr.mxu0 %v1890_v0 }
 0x42d   : > { %v1119_v11 = vpop.f32.mrf.mxu1 }
 0x42e   : > { %v1124_v22 = vadd.f32 %v1119_v11, %v1014_v21  ;;  %v1189_v11 = vld [vmem:[#allocation8 + $0x10] sm:$0xff]  ;;  %v1182_v21 = vld [vmem:[%s2170_s8] sm:$0xf] }
 0x42f   : > { %v1121_v15 = vpop.f32.mrf.mxu1  ;;  %1676 = vmatpush3.msra.mxu1 %v1189_v11 }
 0x430   : > { %v1125_v16 = vadd.f32 %v1121_v15, %v1016_v13  ;;  %v1138_v24 = vadd.f32 %v1131_v23, %v1124_v22  ;;  %v1188_v13 = vld [vmem:[#allocation8 + $0x8] sm:$0xff]  ;;  %1677 = vmatprep.subr.mxu1 %v1890_v0  ;;  %v1187_v15 = vld [vmem:[#allocation8] sm:$0xff] }
 0x431   : > { %1678 = vmatpush3.msra.mxu1 %v1188_v13 }
 0x432   : > { %v1139_v17 = vadd.f32 %v1135_v14, %v1125_v16  ;;  %v1205_v14 = vld [vmem:[#allocation8 + $0x80] sm:$0xff]  ;;  %1679 = vmatprep.subr.mxu1 %v1890_v0 }
 0x433   : > { %1645 = vmatpush3.msra.mxu0 %v1205_v14  ;;  %1680 = vmatpush3.msra.mxu1 %v1187_v15 }
 0x434   : > { %v1559_v18 = vmul.f32 -1.442695, %v1139_v17  ;;  %1684 = vmatprep.subr.mxu0 %v1890_v0 }
 0x436   : > { %1783 = vpow2.f32 %v1559_v18 }
 0x443   : > { %v1784_v19 = vpop.eup %1783 }
 0x444   : > { %v1143_v20 = vadd.f32 1.0, %v1784_v19  ;;  %v1180_v19 = vld [vmem:[%s2169_s7] sm:$0xf] }
 0x446   : > { %1785 = vrcp.f32 %v1143_v20 }
 0x453   : > { %v1786_v25 = vpop.eup %1785 }
 0x454   : > { %v1146_v26 = vmul.f32 %v1786_v25, %v1138_v24  ;;  %v1378_v24 = vld [vmem:[#allocation8 + $0x178] sm:$0xff] }
 0x456   : > { %v1148_v27 = vsel %vm1147_vm1, %v1146_v26, 0.0 }
 0x457   : > { %1149 = vadd.xlane.f32.xlu1 %v1148_v27  ;;  %v1377_v27 = vld [vmem:[#allocation8 + $0x170] sm:$0xff] }
 0x4e0   : > { %v1150_v41 = vpop.xlane.xlu1 %1149 }
 0x4e1   : > { %v1151_v28 = vrot.slane %v1150_v41, 4 }
 0x4e3   : > { %v1152_v29 = vadd.f32 %v1151_v28, %v1150_v41  ;;  %v1376_v41 = vld [vmem:[#allocation8 + $0x168] sm:$0xff]  ;;  %v1375_v28 = vld [vmem:[#allocation8 + $0x160] sm:$0xff] }
 0x4e5   : > { %v1153_v30 = vrot.slane %v1152_v29, 2 }
 0x4e7   : > { %v1154_v31 = vadd.f32 %v1153_v30, %v1152_v29  ;;  %v1374_v29 = vld [vmem:[#allocation8 + $0x158] sm:$0xff]  ;;  %v1373_v30 = vld [vmem:[#allocation8 + $0x150] sm:$0xff] }
 0x4e9   : > { %v1155_v32 = vrot.slane %v1154_v31, 1 }
 0x4eb   : > { %v1156_v33 = vadd.f32 %v1155_v32, %v1154_v31  ;;  %v1372_v31 = vld [vmem:[#allocation8 + $0x148] sm:$0xff]  ;;  %v1371_v32 = vld [vmem:[#allocation8 + $0x140] sm:$0xff] }
 0x4ed   : > { %1726 = vpush %v1156_v33  ;;  %v1370_v33 = vld [vmem:[#allocation8 + $0x138] sm:$0xff] }
 0x51e   : > { %s1727_s23 = spop %1726 }
 0x51f   : > { %s1158_s24 = smul.f32 0.03125, %s1727_s23 }
 0x521   : > { %v1159_v34 = vstv %s1158_s24 }
 0x522   : > { %v1160_v40 = vsub.f32 %v1146_v26, %v1159_v34  ;;  %v1369_v34 = vld [vmem:[#allocation8 + $0x130] sm:$0xff] }
 0x524   : > { %v2088_v54 = vsel %vm780_vm0, %v1160_v40, 0.0  ;;  %v1368_v40 = vld [vmem:[#allocation8 + $0x128] sm:$0xff] }
 0x525   : > { %v1162_v35 = vmul.f32 %v2088_v54, %v2088_v54 }
 0x527   : > { %v1163_v36 = vsel %vm1147_vm1, %v1162_v35, 0.0  ;;  %v1366_v35 = vld [vmem:[#allocation8 + $0x118] sm:$0xff] }
 0x528   : > { %1164 = vadd.xlane.f32.xlu1 %v1163_v36  ;;  %v1365_v36 = vld [vmem:[#allocation8 + $0x110] sm:$0xff] }
 0x5b1   : > { %v1165_v53 = vpop.xlane.xlu1 %1164 }
 0x5b2   : > { %v1166_v55 = vrot.slane %v1165_v53, 4 }
 0x5b4   : > { %v1167_v57 = vadd.f32 %v1166_v55, %v1165_v53 }
 0x5b6   : > { %v1168_v60 = vrot.slane %v1167_v57, 2 }
 0x5b8   : > { %v1169_v63 = vadd.f32 %v1168_v60, %v1167_v57 }
 0x5ba   : > { %v1170_v3 = vrot.slane %v1169_v63, 1 }
 0x5bc   : > { %v1171_v7 = vadd.f32 %v1170_v3, %v1169_v63 }
 0x5be   : > { %1728 = vpush %v1171_v7 }
 0x5ef   : > { %s1729_s26 = spop %1728 }
 0x5f0   : > { %s1173_s27 = smul.f32 0.03125, %s1729_s26 }
 0x5f2   : > { %s1174_s28 = sadd.f32 1e-05, %s1173_s27 }
 0x5f4   : > { %v1175_v16 = vstv %s1174_s28 }
 0x5f5   : > { %1787 = vrsqrt.f32 %v1175_v16 }
 0x602   : > { %v1788_v17 = vpop.eup %1787 }
 0x603   : > { %1730 = vpush %v1788_v17 }
 0x634   : > { %s1731_s29 = spop %1730 }
 0x635   : > { %v1178_v18 = vstv %s1731_s29 }
 0x636   : > { %v1179_v20 = vmul.f32 %v1178_v18, %v2088_v54  ;;  %v1367_v54 = vld [vmem:[#allocation8 + $0x120] sm:$0xff] }
 0x638   : > { %v1181_v22 = vmul.f32 %v1180_v19, %v1179_v20 }
 0x63a   : > { %v1183_v23 = vadd.f32 %v1182_v21, %v1181_v22 }
 0x63c   : > { %1185 = vst [vmem:[#allocation3 + $0x1] sm:$0xf] %v1183_v23 }
 0x643   : > { %v1203_v25 = vld [vmem:[#allocation3 + $0x1] sm:$0xf] }
 0x644   : > { %v1186_v26 = vld [vmem:[#allocation3] sm:$0xf]  ;;  %1647 = vmatmul.mubr.f32.vlgmr.msra.gmra.mxu0 %v1203_v25 }
 0x645   : > { %1682 = vmatmul.mubr.f32.vlgmr.msra.gmra.mxu1 %v1186_v26  ;;  %1685 = vmatpush3.msra.mxu0 %v1378_v24  ;;  %v1361_v38 = vld [vmem:[#allocation3 + $0x2] sm:$0xf] }
 0x646   : > { %1716 = vmatprep.mubr.msk.f32.mxu0 %vm1891_vm2, %v1890_v0  ;;  %1686 = vmatprep.subr.mxu0 %v1890_v0 }
 0x647   : > { %1687 = vmatpush3.msra.mxu0 %v1377_v27 }
 0x648   : > { %1688 = vmatprep.subr.mxu0 %v1890_v0 }
 0x649   : > { %1689 = vmatpush3.msra.mxu0 %v1376_v41 }
 0x64a   : > { %1690 = vmatprep.subr.mxu0 %v1890_v0 }
 0x64b   : > { %1691 = vmatpush3.msra.mxu0 %v1375_v28 }
 0x64c   : > { %1692 = vmatprep.subr.mxu0 %v1890_v0 }
 0x64d   : > { %1693 = vmatpush3.msra.mxu0 %v1374_v29 }
 0x64e   : > { %1694 = vmatprep.subr.mxu0 %v1890_v0 }
 0x64f   : > { %1695 = vmatpush3.msra.mxu0 %v1373_v30 }
 0x650   : > { %1696 = vmatprep.subr.mxu0 %v1890_v0 }
 0x651   : > { %1697 = vmatpush3.msra.mxu0 %v1372_v31 }
 0x652   : > { %1698 = vmatprep.subr.mxu0 %v1890_v0 }
 0x653   : > { %1699 = vmatpush3.msra.mxu0 %v1371_v32 }
 0x654   : > { %1700 = vmatprep.subr.mxu0 %v1890_v0 }
 0x655   : > { %1701 = vmatpush3.msra.mxu0 %v1370_v33 }
 0x656   : > { %1702 = vmatprep.subr.mxu0 %v1890_v0 }
 0x657   : > { %1703 = vmatpush3.msra.mxu0 %v1369_v34 }
 0x658   : > { %1704 = vmatprep.subr.mxu0 %v1890_v0 }
 0x659   : > { %1705 = vmatpush3.msra.mxu0 %v1368_v40 }
 0x65a   : > { %1706 = vmatprep.subr.mxu0 %v1890_v0 }
 0x65b   : > { %1707 = vmatpush3.msra.mxu0 %v1367_v54 }
 0x65c   : > { %1708 = vmatprep.subr.mxu0 %v1890_v0 }
 0x65d   : > { %1709 = vmatpush3.msra.mxu0 %v1366_v35 }
 0x65e   : > { %1710 = vmatprep.subr.mxu0 %v1890_v0 }
 0x65f   : > { %1711 = vmatpush3.msra.mxu0 %v1365_v36 }
 0x660   : > { %1712 = vmatprep.subr.mxu0 %v1890_v0 }
 0x661   : > { %1713 = vmatpush3.msra.mxu0 %v1364_v37 }
 0x662   : > { %1714 = vmatprep.subr.mxu0 %v1890_v0 }
 0x663   : > { %1715 = vmatpush3.msra.mxu0 %v1363_v8 }
 0x664   : > { %1717 = vmatmul.mubr.f32.vlgmr.msra.gmra.mxu0 %v1361_v38 }
 0x704   : > { %v1287_v39 = vpop.f32.mrf.mxu0 }
 0x705   : > { %v1357_v42 = vpop.f32.mrf.mxu1 }
 0x706   : > { %v1648_v5 = vpop.f32.mrf.mxu0  ;;  %v1358_v44 = vadd.f32 %v1357_v42, %v1287_v39 }
 0x707   : > { %v1683_v43 = vpop.f32.mrf.mxu1 }
 0x724   : > { %v1445_v45 = vpop.f32.mrf.mxu0 }
 0x725   : > { %v1449_v47 = vadd.f32 %v1445_v45, %v1358_v44 }
 0x726   : > { %v1718_v0 = vpop.f32.mrf.mxu0 }
 0x727   : > { %v1457_v48 = vadd.f32 %v1560_v46, %v1449_v47 }
 0x729   : > { %1458 = vst [vmem:[%s428_s25] sm:$0xf] %v1457_v48 }
 0x72a PF: > { %s23_s17 = sadd.s32 1, %s1881_s17  }
 0x72b   : > { %p20_p3 = scmp.ge.s32.totalorder %s23_s17, 4  }
 0x72d   :  { %22 = sbr.rel (!%p20_p3) target bundleno = 2 (0x2), region = 117 }
 0x732   :  { %1478 = vsyncpa [#allocation5], 1 }
 0x733   :  { %1480 = vsyncpa [#allocation5 + $0x1], 1 }
 0x734   :  { %1481 = vsyncpa [#allocation7], 1 }

</bundles_post_ra>
